<compile_context>
chip_gen: v6e
topology: v6e:2x2x1
jax: 0.10.0
libtpu: 0.0.40
codegen_flags: <defaults>
</compile_context>

<pallas_src>
import functools
import math

import jax
import jax.numpy as jnp
from jax.experimental import pallas as pl
from jax.experimental.pallas import tpu as pltpu


def _layernorm(x, gamma, beta, eps=1e-5):
    mu = jnp.mean(x, axis=-1, keepdims=True)
    var = jnp.mean((x - mu) ** 2, axis=-1, keepdims=True)
    return (x - mu) * jax.lax.rsqrt(var + eps) * gamma + beta


def _block_kernel(x_ref,
                  ln1_w_ref, ln1_b_ref,
                  wqkv_ref, bqkv_ref,
                  wo_ref, bo_ref,
                  ln2_w_ref, ln2_b_ref,
                  wfc_ref, bfc_ref,
                  wproj_ref, bproj_ref,
                  o_ref,
                  *, emb_dim, n_head, block_batch):
    E, H, B = emb_dim, n_head, block_batch
    dh = E // H
    S = x_ref.shape[1]
    rows = B * S

    # Flatten the block so every projection GEMM runs once with M = B*S rows
    # instead of once per sequence with M = S (fills the MXU pass, removes
    # B-fold loop unrolling / vreg pressure).
    x = x_ref[...].reshape(rows, E).astype(jnp.float32)

    # ---- attention branch: x + out_proj(MHA(LN1(x))) -----------------------
    xn = _layernorm(x, ln1_w_ref[0], ln1_b_ref[0])
    # Fused in-projection (rows, E) @ (E, 3E). wqkv is pre-transposed bf16 with
    # the 1/sqrt(dh) query scale folded into the Q columns (and bias).
    qkv = jnp.dot(xn.astype(jnp.bfloat16), wqkv_ref[...],
                  preferred_element_type=jnp.float32) + bqkv_ref[0]
    qkv_b = qkv.astype(jnp.bfloat16)

    # Per head: attention batched over the block's sequences. The
    # (rows, dh) -> (B, S, dh) reshape only splits the leading (sublane) dim
    # (layout-free when S is a multiple of 8); tokens never mix across
    # sequences because the sequence index is the batch dim of the einsum.
    head_outs = []
    for h in range(H):
        lo = h * dh
        q = qkv_b[:, lo:lo + dh].reshape(B, S, dh)            # pre-scaled
        k = qkv_b[:, E + lo:E + lo + dh].reshape(B, S, dh)
        v = qkv_b[:, 2 * E + lo:2 * E + lo + dh].reshape(B, S, dh)
        s = jnp.einsum('bqd,bkd->bqk', q, k,
                       preferred_element_type=jnp.float32)     # (B, S, S)
        s = s - jnp.max(s, axis=-1, keepdims=True)
        p = jnp.exp(s)
        p = p * pl.reciprocal(jnp.sum(p, axis=-1, keepdims=True), approx=True)
        o_h = jnp.einsum('bqk,bkd->bqd', p.astype(jnp.bfloat16), v,
                         preferred_element_type=jnp.float32)    # (B, S, dh)
        head_outs.append(o_h.reshape(rows, dh))

    # Concatenate heads once (lane axis) and run a single out-projection with
    # full contraction depth K = E instead of H accumulating K = dh matmuls.
    attn = jnp.concatenate(head_outs, axis=-1)                  # (rows, E) fp32
    x1 = x + jnp.dot(attn.astype(jnp.bfloat16), wo_ref[...],
                     preferred_element_type=jnp.float32) + bo_ref[0]

    # ---- MLP branch: x1 + c_proj(QuickGELU(c_fc(LN2(x1)))) ------------------
    x2n = _layernorm(x1, ln2_w_ref[0], ln2_b_ref[0])
    h1 = jnp.dot(x2n.astype(jnp.bfloat16), wfc_ref[...],
                 preferred_element_type=jnp.float32) + bfc_ref[0]
    h1 = h1 * jax.nn.sigmoid(1.702 * h1)                        # QuickGELU fp32
    h2 = jnp.dot(h1.astype(jnp.bfloat16), wproj_ref[...],
                 preferred_element_type=jnp.float32) + bproj_ref[0]

    o_ref[...] = (x1 + h2).reshape(B, S, E).astype(o_ref.dtype)


_WEIGHT_ORDER = ["ln1_w", "ln1_b", "wqkv_t", "bqkv", "wo_t", "bo",
                 "ln2_w", "ln2_b", "wfc_t", "bfc", "wproj_t", "bproj"]


def prepare_params(p, *, emb_dim, n_head):
    """One-time transform of PyTorch-shaped fp32 params into kernel layout:
    pre-transposed bf16 weight matrices, fp32 biases / LN params, and the
    1/sqrt(head_dim) query scale folded into in_proj weight + bias."""
    E = emb_dim
    scale = 1.0 / math.sqrt(E // n_head)
    col_scale = jnp.concatenate(
        [jnp.full((E,), scale, jnp.float32), jnp.ones((2 * E,), jnp.float32)])
    return {
        "ln1_w": p["ln1_w"].astype(jnp.float32),
        "ln1_b": p["ln1_b"].astype(jnp.float32),
        "wqkv_t": (p["wqkv"].T * col_scale[None, :]).astype(jnp.bfloat16),  # (E, 3E)
        "bqkv":   (p["bqkv"] * col_scale[None, :]).astype(jnp.float32),     # (1, 3E)
        "wo_t":   p["wo"].T.astype(jnp.bfloat16),                           # (E, E)
        "bo":     p["bo"].astype(jnp.float32),
        "ln2_w":  p["ln2_w"].astype(jnp.float32),
        "ln2_b":  p["ln2_b"].astype(jnp.float32),
        "wfc_t":  p["wfc"].T.astype(jnp.bfloat16),                          # (E, 4E)
        "bfc":    p["bfc"].astype(jnp.float32),
        "wproj_t": p["wproj"].T.astype(jnp.bfloat16),                       # (4E, E)
        "bproj":  p["bproj"].astype(jnp.float32),
    }


def _pick_block_batch(n_batch, seq, emb, target_bytes=1 << 20):
    """Largest divisor of N whose bf16 activation block stays under
    ~target_bytes while keeping >= 2 grid steps (megacore / v7x 2-TC)."""
    per_seq = seq * emb * 2
    best = 1
    for bb in range(1, n_batch + 1):
        if n_batch % bb:
            continue
        if n_batch >= 2 and n_batch // bb < 2:
            continue
        if bb * per_seq <= target_bytes:
            best = bb
    return best


def _vmem_limit_bytes(weight_bytes, block_act_bytes, interm_bytes):
    """Per-generation VMEM budget: ~80% of physical (128 MiB on v5e/v6e,
    64 MiB on v7x), but no more than the kernel actually needs."""
    try:
        physical = int(pltpu.get_tpu_info().vmem_capacity_bytes)
    except Exception:
        physical = 64 << 20        # conservative fallback, valid on every gen
    cap = (physical * 4) // 5
    need = (2 * weight_bytes            # default double-buffered weight blocks
            + 4 * block_act_bytes       # double-buffered in/out activation blocks
            + interm_bytes              # in-kernel fp32 intermediates
            + (8 << 20))                # compiler scratch headroom
    return int(max(32 << 20, min(need, cap)))


def residual_attention_block(x_nse, kparams, *, emb_dim, n_head, block_batch=None):
    """x_nse: (N, S, E) activations (any float dtype; cast to bf16 at the
    boundary); kparams from prepare_params. Returns (N, S, E) bfloat16."""
    N, S, E = x_nse.shape
    assert E == emb_dim and E % n_head == 0
    if block_batch is None:
        block_batch = _pick_block_batch(N, S, E)
    assert N % block_batch == 0
    grid = (N // block_batch,)

    x_b = x_nse.astype(jnp.bfloat16)   # bf16 activation I/O halves HBM traffic

    def invariant(arr):
        # whole-array block, same block for every grid step (grid-invariant)
        return pl.BlockSpec(arr.shape, lambda b: (0,) * arr.ndim)

    in_specs = [pl.BlockSpec((block_batch, S, E), lambda b: (b, 0, 0))]
    in_specs += [invariant(kparams[name]) for name in _WEIGHT_ORDER]

    kernel = functools.partial(_block_kernel, emb_dim=emb_dim, n_head=n_head,
                               block_batch=block_batch)

    # Advisory cost estimate: 24*E^2 GEMM flops per token + attention.
    flops = N * (24 * S * E * E + 4 * S * S * E)
    transcendentals = N * (n_head * S * S + 4 * S * E)
    weight_bytes = sum(int(kparams[n].size) * kparams[n].dtype.itemsize
                       for n in _WEIGHT_ORDER)
    bytes_accessed = int(weight_bytes + 2 * N * S * E * 2)

    rows = block_batch * S
    block_act_bytes = block_batch * S * E * 2
    interm_bytes = rows * E * 4 * 14 + block_batch * S * S * 4 * 3
    vmem_limit = _vmem_limit_bytes(weight_bytes, block_act_bytes, interm_bytes)

    return pl.pallas_call(
        kernel,
        out_shape=jax.ShapeDtypeStruct((N, S, E), jnp.bfloat16),
        grid_spec=pltpu.PrefetchScalarGridSpec(
            num_scalar_prefetch=0,
            grid=grid,
            in_specs=in_specs,
            out_specs=pl.BlockSpec((block_batch, S, E), lambda b: (b, 0, 0)),
        ),
        compiler_params=pltpu.CompilerParams(
            dimension_semantics=("parallel",),
            vmem_limit_bytes=vmem_limit),
        cost_estimate=pl.CostEstimate(
            flops=flops, transcendentals=transcendentals,
            bytes_accessed=bytes_accessed),
    )(x_b, *[kparams[name] for name in _WEIGHT_ORDER])


def make_params(key, emb_dim):
    """Deterministic synthetic parameters with PyTorch module shapes (fp32)."""
    ks = jax.random.split(key, 8)
    E = emb_dim
    f = lambda k, shape, s: (jax.random.normal(k, shape, jnp.float32) * s)
    return {
        "ln1_w":  jnp.ones((1, E), jnp.float32),
        "ln1_b":  jnp.zeros((1, E), jnp.float32),
        "wqkv":   f(ks[0], (3 * E, E), 0.05),          # in_proj_weight
        "bqkv":   f(ks[1], (1, 3 * E), 0.02),          # in_proj_bias
        "wo":     f(ks[2], (E, E), 0.05),              # out_proj.weight
        "bo":     f(ks[3], (1, E), 0.02),              # out_proj.bias
        "ln2_w":  jnp.ones((1, E), jnp.float32),
        "ln2_b":  jnp.zeros((1, E), jnp.float32),
        "wfc":    f(ks[4], (4 * E, E), 0.05),          # mlp.c_fc.weight
        "bfc":    f(ks[5], (1, 4 * E), 0.02),          # mlp.c_fc.bias
        "wproj":  f(ks[6], (E, 4 * E), 0.05),          # mlp.c_proj.weight
        "bproj":  f(ks[7], (1, E), 0.02),              # mlp.c_proj.bias
    }


def reference_forward(x_nse, p, *, emb_dim, n_head):
    """Pure-JAX fp32 reference (mirrors nn.MultiheadAttention, attn_mask=None)."""
    E, H = emb_dim, n_head
    dh = E // H

    def ln(x, g, b):
        mu = jnp.mean(x, -1, keepdims=True)
        var = jnp.mean((x - mu) ** 2, -1, keepdims=True)
        return (x - mu) / jnp.sqrt(var + 1e-5) * g + b

    def one(x):  # x: (S, E)
        xn = ln(x, p["ln1_w"][0], p["ln1_b"][0])
        qkv = xn @ p["wqkv"].T + p["bqkv"][0]
        q, k, v = jnp.split(qkv, 3, axis=-1)
        q = q.reshape(-1, H, dh).transpose(1, 0, 2) / math.sqrt(dh)
        k = k.reshape(-1, H, dh).transpose(1, 0, 2)
        v = v.reshape(-1, H, dh).transpose(1, 0, 2)
        a = jax.nn.softmax(jnp.einsum("hqd,hkd->hqk", q, k), axis=-1)
        o = jnp.einsum("hqk,hkd->hqd", a, v).transpose(1, 0, 2).reshape(-1, E)
        x1 = x + o @ p["wo"].T + p["bo"][0]
        x2n = ln(x1, p["ln2_w"][0], p["ln2_b"][0])
        h = x2n @ p["wfc"].T + p["bfc"][0]
        h = h * jax.nn.sigmoid(1.702 * h)
        return x1 + h @ p["wproj"].T + p["bproj"][0]

    return jax.vmap(one)(x_nse)


if __name__ == "__main__":
    EMB_DIM = 32
    N_HEAD = 4
    SEQ = 8
    BATCH = 4

    key = jax.random.PRNGKey(0)
    kx, kp = jax.random.split(key)

    # PyTorch MultiheadAttention layout is (S, N, E); build it, then transpose
    # to the (N, S, E) layout the kernel uses.
    x_sne = jax.random.normal(kx, (SEQ, BATCH, EMB_DIM), jnp.float32)
    x_nse = jnp.transpose(x_sne, (1, 0, 2))

    params = make_params(kp, EMB_DIM)
    kparams = prepare_params(params, emb_dim=EMB_DIM, n_head=N_HEAD)

    out = residual_attention_block(x_nse, kparams, emb_dim=EMB_DIM, n_head=N_HEAD)
    out = jax.block_until_ready(out)

    # Reference consumes the same bf16-rounded activations the kernel sees.
    # bf16 I/O + bf16 matmuls (fp32 accum) + approx softmax recip -> loose tol.
    x_in = x_nse.astype(jnp.bfloat16).astype(jnp.float32)
    ref = reference_forward(x_in, params, emb_dim=EMB_DIM, n_head=N_HEAD)
    assert jnp.allclose(out.astype(jnp.float32), ref, rtol=5e-2, atol=5e-2), \
        "mismatch vs reference"

    _ = jnp.transpose(out, (1, 0, 2))   # back to PyTorch's (S, N, E) if needed
    print("KERNEL_OK")
</pallas_src>

<mosaic_0001>
module attributes {stable_mosaic.version = 11 : i64} {
  func.func @_block_kernel(%arg0: i32, %arg1: memref<2x8x32xbf16, #tpu.memory_space<vmem>>, %arg2: memref<1x32xf32, #tpu.memory_space<vmem>>, %arg3: memref<1x32xf32, #tpu.memory_space<vmem>>, %arg4: memref<32x96xbf16, #tpu.memory_space<vmem>>, %arg5: memref<1x96xf32, #tpu.memory_space<vmem>>, %arg6: memref<32x32xbf16, #tpu.memory_space<vmem>>, %arg7: memref<1x32xf32, #tpu.memory_space<vmem>>, %arg8: memref<1x32xf32, #tpu.memory_space<vmem>>, %arg9: memref<1x32xf32, #tpu.memory_space<vmem>>, %arg10: memref<32x128xbf16, #tpu.memory_space<vmem>>, %arg11: memref<1x128xf32, #tpu.memory_space<vmem>>, %arg12: memref<128x32xbf16, #tpu.memory_space<vmem>>, %arg13: memref<1x32xf32, #tpu.memory_space<vmem>>, %arg14: memref<2x8x32xbf16, #tpu.memory_space<vmem>>) attributes {dimension_semantics = [#tpu.dimension_semantics<parallel>], iteration_bounds = array<i64: 2>, scalar_prefetch = 0 : i64, scratch_operands = 0 : i64, tpu.core_type = #tpu.core_type<tc>, window_params = [{transform_indices = @transform_0, window_bounds = array<i64: 2, 8, 32>}, {pipeline_mode = #tpu.pipeline_mode<synchronous>, transform_indices = @transform_1, window_bounds = array<i64: 1, 32>}, {pipeline_mode = #tpu.pipeline_mode<synchronous>, transform_indices = @transform_2, window_bounds = array<i64: 1, 32>}, {pipeline_mode = #tpu.pipeline_mode<synchronous>, transform_indices = @transform_3, window_bounds = array<i64: 32, 96>}, {pipeline_mode = #tpu.pipeline_mode<synchronous>, transform_indices = @transform_4, window_bounds = array<i64: 1, 96>}, {pipeline_mode = #tpu.pipeline_mode<synchronous>, transform_indices = @transform_5, window_bounds = array<i64: 32, 32>}, {pipeline_mode = #tpu.pipeline_mode<synchronous>, transform_indices = @transform_6, window_bounds = array<i64: 1, 32>}, {pipeline_mode = #tpu.pipeline_mode<synchronous>, transform_indices = @transform_7, window_bounds = array<i64: 1, 32>}, {pipeline_mode = #tpu.pipeline_mode<synchronous>, transform_indices = @transform_8, window_bounds = array<i64: 1, 32>}, {pipeline_mode = #tpu.pipeline_mode<synchronous>, transform_indices = @transform_9, window_bounds = array<i64: 32, 128>}, {pipeline_mode = #tpu.pipeline_mode<synchronous>, transform_indices = @transform_10, window_bounds = array<i64: 1, 128>}, {pipeline_mode = #tpu.pipeline_mode<synchronous>, transform_indices = @transform_11, window_bounds = array<i64: 128, 32>}, {pipeline_mode = #tpu.pipeline_mode<synchronous>, transform_indices = @transform_12, window_bounds = array<i64: 1, 32>}, {transform_indices = @transform_13, window_bounds = array<i64: 2, 8, 32>}]} {
    %c0 = arith.constant 0 : index
    %c0_0 = arith.constant 0 : index
    %c0_1 = arith.constant 0 : index
    %0 = vector.load %arg1[%c0, %c0_0, %c0_1] : memref<2x8x32xbf16, #tpu.memory_space<vmem>>, vector<2x8x32xbf16>
    %1 = vector.shape_cast %0 : vector<2x8x32xbf16> to vector<16x32xbf16>
    %2 = arith.extf %1 : vector<16x32xbf16> to vector<16x32xf32>
    %c0_2 = arith.constant 0 : index
    %c0_3 = arith.constant 0 : index
    %3 = vector.load %arg2[%c0_2, %c0_3] : memref<1x32xf32, #tpu.memory_space<vmem>>, vector<1x32xf32>
    %4 = vector.shape_cast %3 : vector<1x32xf32> to vector<32xf32>
    %c0_4 = arith.constant 0 : index
    %c0_5 = arith.constant 0 : index
    %5 = vector.load %arg3[%c0_4, %c0_5] : memref<1x32xf32, #tpu.memory_space<vmem>>, vector<1x32xf32>
    %6 = vector.shape_cast %5 : vector<1x32xf32> to vector<32xf32>
    %cst = arith.constant dense<0.000000e+00> : vector<16xf32>
    %7 = vector.multi_reduction <add>, %2, %cst [1] : vector<16x32xf32> to vector<16xf32>
    %8 = vector.shape_cast %7 : vector<16xf32> to vector<16x1xf32>
    %cst_6 = arith.constant 3.200000e+01 : f32
    %9 = vector.broadcast %cst_6 : f32 to vector<16x1xf32>
    %10 = arith.divf %8, %9 : vector<16x1xf32>
    %11 = vector.broadcast %10 : vector<16x1xf32> to vector<16x32xf32>
    %12 = arith.subf %2, %11 : vector<16x32xf32>
    %13 = arith.mulf %12, %12 : vector<16x32xf32>
    %cst_7 = arith.constant dense<0.000000e+00> : vector<16xf32>
    %14 = vector.multi_reduction <add>, %13, %cst_7 [1] : vector<16x32xf32> to vector<16xf32>
    %15 = vector.shape_cast %14 : vector<16xf32> to vector<16x1xf32>
    %cst_8 = arith.constant 3.200000e+01 : f32
    %16 = vector.broadcast %cst_8 : f32 to vector<16x1xf32>
    %17 = arith.divf %15, %16 : vector<16x1xf32>
    %18 = vector.broadcast %10 : vector<16x1xf32> to vector<16x32xf32>
    %19 = arith.subf %2, %18 : vector<16x32xf32>
    %cst_9 = arith.constant 9.99999974E-6 : f32
    %20 = vector.broadcast %cst_9 : f32 to vector<16x1xf32>
    %21 = arith.addf %17, %20 : vector<16x1xf32>
    %22 = math.rsqrt %21 : vector<16x1xf32>
    %23 = vector.broadcast %22 : vector<16x1xf32> to vector<16x32xf32>
    %24 = arith.mulf %19, %23 : vector<16x32xf32>
    %25 = vector.shape_cast %4 : vector<32xf32> to vector<1x32xf32>
    %26 = vector.broadcast %25 : vector<1x32xf32> to vector<16x32xf32>
    %27 = arith.mulf %24, %26 : vector<16x32xf32>
    %28 = vector.shape_cast %6 : vector<32xf32> to vector<1x32xf32>
    %29 = vector.broadcast %28 : vector<1x32xf32> to vector<16x32xf32>
    %30 = arith.addf %27, %29 : vector<16x32xf32>
    %31 = arith.truncf %30 : vector<16x32xf32> to vector<16x32xbf16>
    %c0_10 = arith.constant 0 : index
    %c0_11 = arith.constant 0 : index
    %32 = vector.load %arg4[%c0_10, %c0_11] : memref<32x96xbf16, #tpu.memory_space<vmem>>, vector<32x96xbf16>
    %cst_12 = arith.constant dense<0.000000e+00> : vector<16x96xf32>
    %33 = tpu.matmul %31, %32, %cst_12 {dimension_numbers = #tpu.dot_dimension_numbers<[1], [0], [0], [1], [0, 0, 1, 1], [], []>} : vector<16x32xbf16>, vector<32x96xbf16>, vector<16x96xf32> -> vector<16x96xf32>
    %c0_13 = arith.constant 0 : index
    %c0_14 = arith.constant 0 : index
    %34 = vector.load %arg5[%c0_13, %c0_14] : memref<1x96xf32, #tpu.memory_space<vmem>>, vector<1x96xf32>
    %35 = vector.shape_cast %34 : vector<1x96xf32> to vector<96xf32>
    %36 = vector.shape_cast %35 : vector<96xf32> to vector<1x96xf32>
    %37 = vector.broadcast %36 : vector<1x96xf32> to vector<16x96xf32>
    %38 = arith.addf %33, %37 : vector<16x96xf32>
    %39 = arith.truncf %38 : vector<16x96xf32> to vector<16x96xbf16>
    %40 = vector.extract_strided_slice %39 {offsets = [0, 0], sizes = [16, 8], strides = [1, 1]} : vector<16x96xbf16> to vector<16x8xbf16>
    %41 = vector.shape_cast %40 : vector<16x8xbf16> to vector<2x8x8xbf16>
    %42 = vector.extract_strided_slice %39 {offsets = [0, 32], sizes = [16, 8], strides = [1, 1]} : vector<16x96xbf16> to vector<16x8xbf16>
    %43 = vector.shape_cast %42 : vector<16x8xbf16> to vector<2x8x8xbf16>
    %44 = vector.extract_strided_slice %39 {offsets = [0, 64], sizes = [16, 8], strides = [1, 1]} : vector<16x96xbf16> to vector<16x8xbf16>
    %45 = vector.shape_cast %44 : vector<16x8xbf16> to vector<2x8x8xbf16>
    "tpu.trace_start"() <{level = 10 : i32, message = "bqd,bkd->bqk"}> : () -> ()
    %cst_15 = arith.constant dense<0.000000e+00> : vector<2x8x8xf32>
    %46 = tpu.matmul %41, %43, %cst_15 {dimension_numbers = #tpu.dot_dimension_numbers<[2], [2], [1], [1], [0, 0, 0, 1, 1, 1], [0], [0]>} : vector<2x8x8xbf16>, vector<2x8x8xbf16>, vector<2x8x8xf32> -> vector<2x8x8xf32>
    "tpu.trace_stop"() : () -> ()
    %cst_16 = arith.constant dense<0xFF800000> : vector<2x8xf32>
    %47 = vector.multi_reduction <maximumf>, %46, %cst_16 [2] : vector<2x8x8xf32> to vector<2x8xf32>
    %48 = vector.shape_cast %47 : vector<2x8xf32> to vector<2x8x1xf32>
    %49 = vector.broadcast %48 : vector<2x8x1xf32> to vector<2x8x8xf32>
    %50 = arith.subf %46, %49 : vector<2x8x8xf32>
    %51 = math.exp %50 : vector<2x8x8xf32>
    %cst_17 = arith.constant dense<0.000000e+00> : vector<2x8xf32>
    %52 = vector.multi_reduction <add>, %51, %cst_17 [2] : vector<2x8x8xf32> to vector<2x8xf32>
    %53 = vector.shape_cast %52 : vector<2x8xf32> to vector<2x8x1xf32>
    %54 = tpu.reciprocal %53 {approx = true} : vector<2x8x1xf32> -> vector<2x8x1xf32>
    %55 = vector.broadcast %54 : vector<2x8x1xf32> to vector<2x8x8xf32>
    %56 = arith.mulf %51, %55 : vector<2x8x8xf32>
    %57 = arith.truncf %56 : vector<2x8x8xf32> to vector<2x8x8xbf16>
    "tpu.trace_start"() <{level = 10 : i32, message = "bqk,bkd->bqd"}> : () -> ()
    %cst_18 = arith.constant dense<0.000000e+00> : vector<2x8x8xf32>
    %58 = tpu.matmul %57, %45, %cst_18 {dimension_numbers = #tpu.dot_dimension_numbers<[2], [1], [1], [2], [0, 0, 0, 1, 1, 2], [0], [0]>} : vector<2x8x8xbf16>, vector<2x8x8xbf16>, vector<2x8x8xf32> -> vector<2x8x8xf32>
    "tpu.trace_stop"() : () -> ()
    %59 = vector.shape_cast %58 : vector<2x8x8xf32> to vector<16x8xf32>
    %60 = vector.extract_strided_slice %39 {offsets = [0, 8], sizes = [16, 8], strides = [1, 1]} : vector<16x96xbf16> to vector<16x8xbf16>
    %61 = vector.shape_cast %60 : vector<16x8xbf16> to vector<2x8x8xbf16>
    %62 = vector.extract_strided_slice %39 {offsets = [0, 40], sizes = [16, 8], strides = [1, 1]} : vector<16x96xbf16> to vector<16x8xbf16>
    %63 = vector.shape_cast %62 : vector<16x8xbf16> to vector<2x8x8xbf16>
    %64 = vector.extract_strided_slice %39 {offsets = [0, 72], sizes = [16, 8], strides = [1, 1]} : vector<16x96xbf16> to vector<16x8xbf16>
    %65 = vector.shape_cast %64 : vector<16x8xbf16> to vector<2x8x8xbf16>
    "tpu.trace_start"() <{level = 10 : i32, message = "bqd,bkd->bqk"}> : () -> ()
    %cst_19 = arith.constant dense<0.000000e+00> : vector<2x8x8xf32>
    %66 = tpu.matmul %61, %63, %cst_19 {dimension_numbers = #tpu.dot_dimension_numbers<[2], [2], [1], [1], [0, 0, 0, 1, 1, 1], [0], [0]>} : vector<2x8x8xbf16>, vector<2x8x8xbf16>, vector<2x8x8xf32> -> vector<2x8x8xf32>
    "tpu.trace_stop"() : () -> ()
    %cst_20 = arith.constant dense<0xFF800000> : vector<2x8xf32>
    %67 = vector.multi_reduction <maximumf>, %66, %cst_20 [2] : vector<2x8x8xf32> to vector<2x8xf32>
    %68 = vector.shape_cast %67 : vector<2x8xf32> to vector<2x8x1xf32>
    %69 = vector.broadcast %68 : vector<2x8x1xf32> to vector<2x8x8xf32>
    %70 = arith.subf %66, %69 : vector<2x8x8xf32>
    %71 = math.exp %70 : vector<2x8x8xf32>
    %cst_21 = arith.constant dense<0.000000e+00> : vector<2x8xf32>
    %72 = vector.multi_reduction <add>, %71, %cst_21 [2] : vector<2x8x8xf32> to vector<2x8xf32>
    %73 = vector.shape_cast %72 : vector<2x8xf32> to vector<2x8x1xf32>
    %74 = tpu.reciprocal %73 {approx = true} : vector<2x8x1xf32> -> vector<2x8x1xf32>
    %75 = vector.broadcast %74 : vector<2x8x1xf32> to vector<2x8x8xf32>
    %76 = arith.mulf %71, %75 : vector<2x8x8xf32>
    %77 = arith.truncf %76 : vector<2x8x8xf32> to vector<2x8x8xbf16>
    "tpu.trace_start"() <{level = 10 : i32, message = "bqk,bkd->bqd"}> : () -> ()
    %cst_22 = arith.constant dense<0.000000e+00> : vector<2x8x8xf32>
    %78 = tpu.matmul %77, %65, %cst_22 {dimension_numbers = #tpu.dot_dimension_numbers<[2], [1], [1], [2], [0, 0, 0, 1, 1, 2], [0], [0]>} : vector<2x8x8xbf16>, vector<2x8x8xbf16>, vector<2x8x8xf32> -> vector<2x8x8xf32>
    "tpu.trace_stop"() : () -> ()
    %79 = vector.shape_cast %78 : vector<2x8x8xf32> to vector<16x8xf32>
    %80 = vector.extract_strided_slice %39 {offsets = [0, 16], sizes = [16, 8], strides = [1, 1]} : vector<16x96xbf16> to vector<16x8xbf16>
    %81 = vector.shape_cast %80 : vector<16x8xbf16> to vector<2x8x8xbf16>
    %82 = vector.extract_strided_slice %39 {offsets = [0, 48], sizes = [16, 8], strides = [1, 1]} : vector<16x96xbf16> to vector<16x8xbf16>
    %83 = vector.shape_cast %82 : vector<16x8xbf16> to vector<2x8x8xbf16>
    %84 = vector.extract_strided_slice %39 {offsets = [0, 80], sizes = [16, 8], strides = [1, 1]} : vector<16x96xbf16> to vector<16x8xbf16>
    %85 = vector.shape_cast %84 : vector<16x8xbf16> to vector<2x8x8xbf16>
    "tpu.trace_start"() <{level = 10 : i32, message = "bqd,bkd->bqk"}> : () -> ()
    %cst_23 = arith.constant dense<0.000000e+00> : vector<2x8x8xf32>
    %86 = tpu.matmul %81, %83, %cst_23 {dimension_numbers = #tpu.dot_dimension_numbers<[2], [2], [1], [1], [0, 0, 0, 1, 1, 1], [0], [0]>} : vector<2x8x8xbf16>, vector<2x8x8xbf16>, vector<2x8x8xf32> -> vector<2x8x8xf32>
    "tpu.trace_stop"() : () -> ()
    %cst_24 = arith.constant dense<0xFF800000> : vector<2x8xf32>
    %87 = vector.multi_reduction <maximumf>, %86, %cst_24 [2] : vector<2x8x8xf32> to vector<2x8xf32>
    %88 = vector.shape_cast %87 : vector<2x8xf32> to vector<2x8x1xf32>
    %89 = vector.broadcast %88 : vector<2x8x1xf32> to vector<2x8x8xf32>
    %90 = arith.subf %86, %89 : vector<2x8x8xf32>
    %91 = math.exp %90 : vector<2x8x8xf32>
    %cst_25 = arith.constant dense<0.000000e+00> : vector<2x8xf32>
    %92 = vector.multi_reduction <add>, %91, %cst_25 [2] : vector<2x8x8xf32> to vector<2x8xf32>
    %93 = vector.shape_cast %92 : vector<2x8xf32> to vector<2x8x1xf32>
    %94 = tpu.reciprocal %93 {approx = true} : vector<2x8x1xf32> -> vector<2x8x1xf32>
    %95 = vector.broadcast %94 : vector<2x8x1xf32> to vector<2x8x8xf32>
    %96 = arith.mulf %91, %95 : vector<2x8x8xf32>
    %97 = arith.truncf %96 : vector<2x8x8xf32> to vector<2x8x8xbf16>
    "tpu.trace_start"() <{level = 10 : i32, message = "bqk,bkd->bqd"}> : () -> ()
    %cst_26 = arith.constant dense<0.000000e+00> : vector<2x8x8xf32>
    %98 = tpu.matmul %97, %85, %cst_26 {dimension_numbers = #tpu.dot_dimension_numbers<[2], [1], [1], [2], [0, 0, 0, 1, 1, 2], [0], [0]>} : vector<2x8x8xbf16>, vector<2x8x8xbf16>, vector<2x8x8xf32> -> vector<2x8x8xf32>
    "tpu.trace_stop"() : () -> ()
    %99 = vector.shape_cast %98 : vector<2x8x8xf32> to vector<16x8xf32>
    %100 = vector.extract_strided_slice %39 {offsets = [0, 24], sizes = [16, 8], strides = [1, 1]} : vector<16x96xbf16> to vector<16x8xbf16>
    %101 = vector.shape_cast %100 : vector<16x8xbf16> to vector<2x8x8xbf16>
    %102 = vector.extract_strided_slice %39 {offsets = [0, 56], sizes = [16, 8], strides = [1, 1]} : vector<16x96xbf16> to vector<16x8xbf16>
    %103 = vector.shape_cast %102 : vector<16x8xbf16> to vector<2x8x8xbf16>
    %104 = vector.extract_strided_slice %39 {offsets = [0, 88], sizes = [16, 8], strides = [1, 1]} : vector<16x96xbf16> to vector<16x8xbf16>
    %105 = vector.shape_cast %104 : vector<16x8xbf16> to vector<2x8x8xbf16>
    "tpu.trace_start"() <{level = 10 : i32, message = "bqd,bkd->bqk"}> : () -> ()
    %cst_27 = arith.constant dense<0.000000e+00> : vector<2x8x8xf32>
    %106 = tpu.matmul %101, %103, %cst_27 {dimension_numbers = #tpu.dot_dimension_numbers<[2], [2], [1], [1], [0, 0, 0, 1, 1, 1], [0], [0]>} : vector<2x8x8xbf16>, vector<2x8x8xbf16>, vector<2x8x8xf32> -> vector<2x8x8xf32>
    "tpu.trace_stop"() : () -> ()
    %cst_28 = arith.constant dense<0xFF800000> : vector<2x8xf32>
    %107 = vector.multi_reduction <maximumf>, %106, %cst_28 [2] : vector<2x8x8xf32> to vector<2x8xf32>
    %108 = vector.shape_cast %107 : vector<2x8xf32> to vector<2x8x1xf32>
    %109 = vector.broadcast %108 : vector<2x8x1xf32> to vector<2x8x8xf32>
    %110 = arith.subf %106, %109 : vector<2x8x8xf32>
    %111 = math.exp %110 : vector<2x8x8xf32>
    %cst_29 = arith.constant dense<0.000000e+00> : vector<2x8xf32>
    %112 = vector.multi_reduction <add>, %111, %cst_29 [2] : vector<2x8x8xf32> to vector<2x8xf32>
    %113 = vector.shape_cast %112 : vector<2x8xf32> to vector<2x8x1xf32>
    %114 = tpu.reciprocal %113 {approx = true} : vector<2x8x1xf32> -> vector<2x8x1xf32>
    %115 = vector.broadcast %114 : vector<2x8x1xf32> to vector<2x8x8xf32>
    %116 = arith.mulf %111, %115 : vector<2x8x8xf32>
    %117 = arith.truncf %116 : vector<2x8x8xf32> to vector<2x8x8xbf16>
    "tpu.trace_start"() <{level = 10 : i32, message = "bqk,bkd->bqd"}> : () -> ()
    %cst_30 = arith.constant dense<0.000000e+00> : vector<2x8x8xf32>
    %118 = tpu.matmul %117, %105, %cst_30 {dimension_numbers = #tpu.dot_dimension_numbers<[2], [1], [1], [2], [0, 0, 0, 1, 1, 2], [0], [0]>} : vector<2x8x8xbf16>, vector<2x8x8xbf16>, vector<2x8x8xf32> -> vector<2x8x8xf32>
    "tpu.trace_stop"() : () -> ()
    %119 = vector.shape_cast %118 : vector<2x8x8xf32> to vector<16x8xf32>
    %120 = tpu.concatenate %59, %79, %99, %119 in 1 : vector<16x8xf32>, vector<16x8xf32>, vector<16x8xf32>, vector<16x8xf32> -> vector<16x32xf32>
    %121 = arith.truncf %120 : vector<16x32xf32> to vector<16x32xbf16>
    %c0_31 = arith.constant 0 : index
    %c0_32 = arith.constant 0 : index
    %122 = vector.load %arg6[%c0_31, %c0_32] : memref<32x32xbf16, #tpu.memory_space<vmem>>, vector<32x32xbf16>
    %cst_33 = arith.constant dense<0.000000e+00> : vector<16x32xf32>
    %123 = tpu.matmul %121, %122, %cst_33 {dimension_numbers = #tpu.dot_dimension_numbers<[1], [0], [0], [1], [0, 0, 1, 1], [], []>} : vector<16x32xbf16>, vector<32x32xbf16>, vector<16x32xf32> -> vector<16x32xf32>
    %124 = arith.addf %2, %123 : vector<16x32xf32>
    %c0_34 = arith.constant 0 : index
    %c0_35 = arith.constant 0 : index
    %125 = vector.load %arg7[%c0_34, %c0_35] : memref<1x32xf32, #tpu.memory_space<vmem>>, vector<1x32xf32>
    %126 = vector.shape_cast %125 : vector<1x32xf32> to vector<32xf32>
    %127 = vector.shape_cast %126 : vector<32xf32> to vector<1x32xf32>
    %128 = vector.broadcast %127 : vector<1x32xf32> to vector<16x32xf32>
    %129 = arith.addf %124, %128 : vector<16x32xf32>
    %c0_36 = arith.constant 0 : index
    %c0_37 = arith.constant 0 : index
    %130 = vector.load %arg8[%c0_36, %c0_37] : memref<1x32xf32, #tpu.memory_space<vmem>>, vector<1x32xf32>
    %131 = vector.shape_cast %130 : vector<1x32xf32> to vector<32xf32>
    %c0_38 = arith.constant 0 : index
    %c0_39 = arith.constant 0 : index
    %132 = vector.load %arg9[%c0_38, %c0_39] : memref<1x32xf32, #tpu.memory_space<vmem>>, vector<1x32xf32>
    %133 = vector.shape_cast %132 : vector<1x32xf32> to vector<32xf32>
    %cst_40 = arith.constant dense<0.000000e+00> : vector<16xf32>
    %134 = vector.multi_reduction <add>, %129, %cst_40 [1] : vector<16x32xf32> to vector<16xf32>
    %135 = vector.shape_cast %134 : vector<16xf32> to vector<16x1xf32>
    %cst_41 = arith.constant 3.200000e+01 : f32
    %136 = vector.broadcast %cst_41 : f32 to vector<16x1xf32>
    %137 = arith.divf %135, %136 : vector<16x1xf32>
    %138 = vector.broadcast %137 : vector<16x1xf32> to vector<16x32xf32>
    %139 = arith.subf %129, %138 : vector<16x32xf32>
    %140 = arith.mulf %139, %139 : vector<16x32xf32>
    %cst_42 = arith.constant dense<0.000000e+00> : vector<16xf32>
    %141 = vector.multi_reduction <add>, %140, %cst_42 [1] : vector<16x32xf32> to vector<16xf32>
    %142 = vector.shape_cast %141 : vector<16xf32> to vector<16x1xf32>
    %cst_43 = arith.constant 3.200000e+01 : f32
    %143 = vector.broadcast %cst_43 : f32 to vector<16x1xf32>
    %144 = arith.divf %142, %143 : vector<16x1xf32>
    %145 = vector.broadcast %137 : vector<16x1xf32> to vector<16x32xf32>
    %146 = arith.subf %129, %145 : vector<16x32xf32>
    %cst_44 = arith.constant 9.99999974E-6 : f32
    %147 = vector.broadcast %cst_44 : f32 to vector<16x1xf32>
    %148 = arith.addf %144, %147 : vector<16x1xf32>
    %149 = math.rsqrt %148 : vector<16x1xf32>
    %150 = vector.broadcast %149 : vector<16x1xf32> to vector<16x32xf32>
    %151 = arith.mulf %146, %150 : vector<16x32xf32>
    %152 = vector.shape_cast %131 : vector<32xf32> to vector<1x32xf32>
    %153 = vector.broadcast %152 : vector<1x32xf32> to vector<16x32xf32>
    %154 = arith.mulf %151, %153 : vector<16x32xf32>
    %155 = vector.shape_cast %133 : vector<32xf32> to vector<1x32xf32>
    %156 = vector.broadcast %155 : vector<1x32xf32> to vector<16x32xf32>
    %157 = arith.addf %154, %156 : vector<16x32xf32>
    %158 = arith.truncf %157 : vector<16x32xf32> to vector<16x32xbf16>
    %c0_45 = arith.constant 0 : index
    %c0_46 = arith.constant 0 : index
    %159 = vector.load %arg10[%c0_45, %c0_46] : memref<32x128xbf16, #tpu.memory_space<vmem>>, vector<32x128xbf16>
    %cst_47 = arith.constant dense<0.000000e+00> : vector<16x128xf32>
    %160 = tpu.matmul %158, %159, %cst_47 {dimension_numbers = #tpu.dot_dimension_numbers<[1], [0], [0], [1], [0, 0, 1, 1], [], []>} : vector<16x32xbf16>, vector<32x128xbf16>, vector<16x128xf32> -> vector<16x128xf32>
    %c0_48 = arith.constant 0 : index
    %c0_49 = arith.constant 0 : index
    %161 = vector.load %arg11[%c0_48, %c0_49] : memref<1x128xf32, #tpu.memory_space<vmem>>, vector<1x128xf32>
    %162 = vector.shape_cast %161 : vector<1x128xf32> to vector<128xf32>
    %163 = vector.shape_cast %162 : vector<128xf32> to vector<1x128xf32>
    %164 = vector.broadcast %163 : vector<1x128xf32> to vector<16x128xf32>
    %165 = arith.addf %160, %164 : vector<16x128xf32>
    %cst_50 = arith.constant 1.702000e+00 : f32
    %166 = vector.broadcast %cst_50 : f32 to vector<16x128xf32>
    %167 = arith.mulf %166, %165 : vector<16x128xf32>
    %168 = arith.negf %167 : vector<16x128xf32>
    %169 = math.exp %168 : vector<16x128xf32>
    %cst_51 = arith.constant 1.000000e+00 : f32
    %170 = vector.broadcast %cst_51 : f32 to vector<16x128xf32>
    %171 = arith.addf %170, %169 : vector<16x128xf32>
    %172 = arith.divf %170, %171 : vector<16x128xf32>
    %173 = arith.mulf %165, %172 : vector<16x128xf32>
    %174 = arith.truncf %173 : vector<16x128xf32> to vector<16x128xbf16>
    %c0_52 = arith.constant 0 : index
    %c0_53 = arith.constant 0 : index
    %175 = vector.load %arg12[%c0_52, %c0_53] : memref<128x32xbf16, #tpu.memory_space<vmem>>, vector<128x32xbf16>
    %cst_54 = arith.constant dense<0.000000e+00> : vector<16x32xf32>
    %176 = tpu.matmul %174, %175, %cst_54 {dimension_numbers = #tpu.dot_dimension_numbers<[1], [0], [0], [1], [0, 0, 1, 1], [], []>} : vector<16x128xbf16>, vector<128x32xbf16>, vector<16x32xf32> -> vector<16x32xf32>
    %c0_55 = arith.constant 0 : index
    %c0_56 = arith.constant 0 : index
    %177 = vector.load %arg13[%c0_55, %c0_56] : memref<1x32xf32, #tpu.memory_space<vmem>>, vector<1x32xf32>
    %178 = vector.shape_cast %177 : vector<1x32xf32> to vector<32xf32>
    %179 = vector.shape_cast %178 : vector<32xf32> to vector<1x32xf32>
    %180 = vector.broadcast %179 : vector<1x32xf32> to vector<16x32xf32>
    %181 = arith.addf %176, %180 : vector<16x32xf32>
    %182 = arith.addf %129, %181 : vector<16x32xf32>
    %183 = vector.shape_cast %182 : vector<16x32xf32> to vector<2x8x32xf32>
    %184 = arith.truncf %183 : vector<2x8x32xf32> to vector<2x8x32xbf16>
    %c0_57 = arith.constant 0 : index
    %c0_58 = arith.constant 0 : index
    %c0_59 = arith.constant 0 : index
    %185 = vector.load %arg14[%c0_57, %c0_58, %c0_59] : memref<2x8x32xbf16, #tpu.memory_space<vmem>>, vector<2x8x32xbf16>
    tpu.vector_store %arg14[%c0_57, %c0_58, %c0_59], %184 {strides = array<i32>} : memref<2x8x32xbf16, #tpu.memory_space<vmem>>, vector<2x8x32xbf16>,
    return
  }
  func.func @transform_0(%arg0: i32) -> (i32, i32, i32) {
    %c0_i32 = arith.constant 0 : i32
    %c0_i32_0 = arith.constant 0 : i32
    %c0_i32_1 = arith.constant 0 : i32
    return %arg0, %c0_i32, %c0_i32_0 : i32, i32, i32
  }
  func.func @transform_1(%arg0: i32) -> (i32, i32) {
    %c0_i32 = arith.constant 0 : i32
    %c0_i32_0 = arith.constant 0 : i32
    %c0_i32_1 = arith.constant 0 : i32
    return %c0_i32, %c0_i32_0 : i32, i32
  }
  func.func @transform_2(%arg0: i32) -> (i32, i32) {
    %c0_i32 = arith.constant 0 : i32
    %c0_i32_0 = arith.constant 0 : i32
    %c0_i32_1 = arith.constant 0 : i32
    return %c0_i32, %c0_i32_0 : i32, i32
  }
  func.func @transform_3(%arg0: i32) -> (i32, i32) {
    %c0_i32 = arith.constant 0 : i32
    %c0_i32_0 = arith.constant 0 : i32
    %c0_i32_1 = arith.constant 0 : i32
    return %c0_i32, %c0_i32_0 : i32, i32
  }
  func.func @transform_4(%arg0: i32) -> (i32, i32) {
    %c0_i32 = arith.constant 0 : i32
    %c0_i32_0 = arith.constant 0 : i32
    %c0_i32_1 = arith.constant 0 : i32
    return %c0_i32, %c0_i32_0 : i32, i32
  }
  func.func @transform_5(%arg0: i32) -> (i32, i32) {
    %c0_i32 = arith.constant 0 : i32
    %c0_i32_0 = arith.constant 0 : i32
    %c0_i32_1 = arith.constant 0 : i32
    return %c0_i32, %c0_i32_0 : i32, i32
  }
  func.func @transform_6(%arg0: i32) -> (i32, i32) {
    %c0_i32 = arith.constant 0 : i32
    %c0_i32_0 = arith.constant 0 : i32
    %c0_i32_1 = arith.constant 0 : i32
    return %c0_i32, %c0_i32_0 : i32, i32
  }
  func.func @transform_7(%arg0: i32) -> (i32, i32) {
    %c0_i32 = arith.constant 0 : i32
    %c0_i32_0 = arith.constant 0 : i32
    %c0_i32_1 = arith.constant 0 : i32
    return %c0_i32, %c0_i32_0 : i32, i32
  }
  func.func @transform_8(%arg0: i32) -> (i32, i32) {
    %c0_i32 = arith.constant 0 : i32
    %c0_i32_0 = arith.constant 0 : i32
    %c0_i32_1 = arith.constant 0 : i32
    return %c0_i32, %c0_i32_0 : i32, i32
  }
  func.func @transform_9(%arg0: i32) -> (i32, i32) {
    %c0_i32 = arith.constant 0 : i32
    %c0_i32_0 = arith.constant 0 : i32
    %c0_i32_1 = arith.constant 0 : i32
    return %c0_i32, %c0_i32_0 : i32, i32
  }
  func.func @transform_10(%arg0: i32) -> (i32, i32) {
    %c0_i32 = arith.constant 0 : i32
    %c0_i32_0 = arith.constant 0 : i32
    %c0_i32_1 = arith.constant 0 : i32
    return %c0_i32, %c0_i32_0 : i32, i32
  }
  func.func @transform_11(%arg0: i32) -> (i32, i32) {
    %c0_i32 = arith.constant 0 : i32
    %c0_i32_0 = arith.constant 0 : i32
    %c0_i32_1 = arith.constant 0 : i32
    return %c0_i32, %c0_i32_0 : i32, i32
  }
  func.func @transform_12(%arg0: i32) -> (i32, i32) {
    %c0_i32 = arith.constant 0 : i32
    %c0_i32_0 = arith.constant 0 : i32
    %c0_i32_1 = arith.constant 0 : i32
    return %c0_i32, %c0_i32_0 : i32, i32
  }
  func.func @transform_13(%arg0: i32) -> (i32, i32, i32) {
    %c0_i32 = arith.constant 0 : i32
    %c0_i32_0 = arith.constant 0 : i32
    %c0_i32_1 = arith.constant 0 : i32
    return %arg0, %c0_i32, %c0_i32_0 : i32, i32, i32
  }
}

</mosaic_0001>

<bundles_post_ra>
// kernel: tpu_custom_call.1
= control target key start
LH: loop header
LB: loop body
LE: loop exit
PB: predicated region body
PF: predicated region fallthrough
CT: control target
= control target key end

     0   :  { %s2775_s0 = inlined_call_operand.vmem [shape: bf16[4,8,32], index: 0, kind: input, shape index: {}]   ;;  %s2776_s1 = inlined_call_operand.vmem [shape: f32[1,32], index: 1, kind: input, shape index: {}]   ;;  %s2777_s2 = inlined_call_operand.vmem [shape: f32[1,32], index: 2, kind: input, shape index: {}]   ;;  %s2778_s3 = inlined_call_operand.vmem [shape: bf16[32,96], index: 3, kind: input, shape index: {}]   ;;  %s2779_s4 = inlined_call_operand.vmem [shape: f32[1,96], index: 4, kind: input, shape index: {}]   ;;  %s2780_s5 = inlined_call_operand.vmem [shape: bf16[32,32], index: 5, kind: input, shape index: {}]   ;;  %s2781_s6 = inlined_call_operand.vmem [shape: f32[1,32], index: 6, kind: input, shape index: {}]   ;;  %s2782_s7 = inlined_call_operand.vmem [shape: f32[1,32], index: 7, kind: input, shape index: {}]   ;;  %s2783_s8 = inlined_call_operand.vmem [shape: f32[1,32], index: 8, kind: input, shape index: {}]   ;;  %s2784_s9 = inlined_call_operand.vmem [shape: bf16[32,128], index: 9, kind: input, shape index: {}]   ;;  %s2785_s10 = inlined_call_operand.vmem [shape: f32[1,128], index: 10, kind: input, shape index: {}]   ;;  %s2786_s11 = inlined_call_operand.vmem [shape: bf16[128,32], index: 11, kind: input, shape index: {}]   ;;  %s2787_s12 = inlined_call_operand.vmem [shape: f32[1,32], index: 12, kind: input, shape index: {}]   ;;  %s2788_s13 = inlined_call_operand.hbm [shape: bf16[4,8,32], index: 13, kind: output, shape index: {}]  }
   0x1   :  { %2790 = sst [smem:[#allocation5_spill]] %s2775_s0 }
   0x2   :  { %2791 = sst [smem:[#allocation6_spill]] %s2776_s1 }
   0x3   :  { %2792 = sst [smem:[#allocation7_spill]] %s2777_s2 }
   0x4   :  { %18 = vsyncpa [#allocation3], 0 }
   0x5   :  { %20 = vsyncpa [#allocation3 + $0x1], 0  ;;  %s2410_s25 = smov 0   ;;  %s2412_s26 = smov 0  }
   0x6   :  { %s2414_s27 = smov 0   ;;  %s2416_s28 = smov 0  }
   0x7 LB: > { %s2431_s29 = sadd.s32 4294967295, %s2320_s28   ;;  %s1873_s30 = sadd.s32 4294967294, %s2320_s28   ;;  %s2320_s28 = sphi %s2416_s28, %s2802_s28   ;;  %s2316_s27 = sphi %s2414_s27, %s2801_s27   ;;  %s2312_s26 = sphi %s2412_s26, %s2800_s26   ;;  %s2308_s25 = sphi %s2410_s25, %s2799_s25  }
   0x8   : > { %s2435_s14 = sadd.s32 1, %s2320_s28   ;;  %s311_s15 = sadd.s32 1, %s2316_s27 }
   0x9   : > { %s308_s16 = ssub.s32 %s2320_s28, %s2435_s14  ;;  %p321_p0 = scmp.ne.s32.totalorder %s2316_s27, %s2312_s26 }
   0xa   : > { %p309_p1 = scmp.eq.s32.totalorder %s308_s16, 0  ;;  %p322_p2 = scmp.eq.s32.totalorder %s2431_s29, 1 }
   0xb   : > { %p327_p3 = scmp.ne.s32.totalorder %s2312_s26, %s2308_s25  ;;  %p328_p4 = scmp.eq.s32.totalorder %s1873_s30, 1 }
   0xc   : > { %s2446_s17 = scalar_select %p309_p1, %s2316_s27, %s311_s15  }
   0xd   : > { %p2448_p5 = por %p322_p2, %p321_p0  ;;  %p2452_p6 = por %p328_p4, %p327_p3 }
   0xe   : > { %p1876_p7 = scmp.ge.s32.totalorder %s2320_s28, 1  ;;  %p391_p8 = scmp.lt.s32.totalorder %s2320_s28, 3 }
  0x10   : > { %p392_p9 = pnand %p1876_p7, %p391_p8 }
  0x11   : > { %s1878_s20 = sshll.u32 (!%p392_p9), %s2431_s29, 1  ;;  %s2795_s0 = sld [smem:[#allocation5_spill]] (!%p392_p9) }
  0x12   : > { %395 = sbr.rel (%p392_p9) target bundleno = 4003 (0xfa3), region = 72  ;;  %p436_p10 = scmp.lt.s32.totalorder (!%p392_p9), %s1878_s20, 3 }
  0x13   : > { %s2796_s1 = sld [smem:[#allocation6_spill]] (!%p392_p9)  ;;  %s2324_s16 = smov (!%p392_p9), 96  }
  0x14   : > { %s2797_s2 = sld [smem:[#allocation7_spill]] (!%p392_p9)  ;;  %s2327_s22 = smov (!%p392_p9), 120  }
  0x15   : > { %s2328_s23 = smov (!%p392_p9), 56   ;;  %s2330_s30 = smov (!%p392_p9), 112  }
  0x16   : > { %s2331_s15 = smov (!%p392_p9), 48  }
  0x17   : > { %s2804_s20 = smov (!%p436_p10, %s1878_s20), 3  ;;  %vm449_vm0 = vcmask 261120   ;;  %v2198_v15 = vld [vmem:[%s2778_s3 + $0x8] sm:$0xff]   ;;  %v2322_v16 = vmov 0.0   ;;  %vm2323_vm1 = vmmov 0   ;;  %v2199_v17 = vld [vmem:[%s2778_s3] sm:$0xff]  }
  0x18   : > { %s1879_s21 = sshll.u32 %s2804_s20, 2  ;;  %1987 = vmatprep.subr.bf16.mxu0 %v2322_v16  ;;  %1991 = vmatprep.mubr.msk.bf16.mxu0 %vm2323_vm1, %v2322_v16  ;;  %v1882_v35 = vld [vmem:[%s2779_s4] ss:$0 sm:$0xff]  ;;  %vm569_vm2 = vcmask 64512   ;;  %s2789_s20 = smov 64   ;;  %vm693_vm3 = vcmask 1043456  }
  0x19   : > { %s439_s24 = scalar_lea.vmem %s2795_s0, %s1879_s21  ;;  %1988 = vmatpush3.bf16.msra.mxu0 %v2198_v15  ;;  %2007 = vmatprep.subr.bf16.mxu1 %v2322_v16  ;;  %v1880_v26 = vld [vmem:[%s2796_s1] ss:$0 sm:$0xff]  ;;  %s2326_s21 = smov 88   ;;  %vm1471_vm4 = vcmask 130048   ;;  %vm1474_vm5 = vcmask 195584   ;;  %vm1794_vm6 = vcmask 257024  }
  0x1a   : > { %v1934_v0 = vld [vmem:[%s439_s24] sm:$0xff]   ;;  %1989 = vmatprep.subr.bf16.mxu0 %v2322_v16  ;;  %2009 = vmatprep.mubr.msk.bf16.mxu1 %vm2323_vm1, %v2322_v16  ;;  %s2329_s24 = smov 80  }
  0x1b   : > { %v2462_v1 = vunpack.c.l.bf16 %v1934_v0  ;;  %v2464_v2 = vunpack.c.h.bf16 %v1934_v0  ;;  %v1881_v30 = vld [vmem:[%s2797_s2] ss:$0 sm:$0xff] }
  0x1d   : > { %v450_v3 = vsel %vm449_vm0, %v2462_v1, 0.0  ;;  %v453_v4 = vsel %vm449_vm0, %v2464_v2, 0.0  ;;  %1990 = vmatpush3.bf16.msra.mxu0 %v2199_v17 }
  0x1e   : > { %451 = vadd.xlane.f32.xlu0 %v450_v3  ;;  %1995 = vmatprep.subr.bf16.mxu0 %v2322_v16 }
  0x22   : > { %454 = vadd.xlane.f32.xlu0 %v453_v4 }
  0xa7   : > { %v452_v5 = vpop.xlane.xlu0 %451 }
  0xa8   : > { %v457_v6 = vmul.f32 0.03125, %v452_v5 }
  0xaa   : > { %v459_v7 = vsub.f32 %v2462_v1, %v457_v6 }
  0xab   : > { %v455_v8 = vpop.xlane.xlu0 %454 }
  0xac   : > { %v458_v9 = vmul.f32 0.03125, %v455_v8  ;;  %v461_v10 = vmul.f32 %v459_v7, %v459_v7 }
  0xae   : > { %v460_v11 = vsub.f32 %v2464_v2, %v458_v9  ;;  %v463_v12 = vsel %vm449_vm0, %v461_v10, 0.0 }
  0xaf   : > { %464 = vadd.xlane.f32.xlu1 %v463_v12 }
  0xb0   : > { %v462_v13 = vmul.f32 %v460_v11, %v460_v11 }
  0xb2   : > { %v466_v14 = vsel %vm449_vm0, %v462_v13, 0.0 }
  0xb3   : > { %467 = vadd.xlane.f32.xlu1 %v466_v14 }
 0x138   : > { %v465_v18 = vpop.xlane.xlu1 %464 }
 0x139   : > { %v469_v19 = vmul.f32 0.03125, %v465_v18 }
 0x13b   : > { %v471_v20 = vadd.f32 1e-05, %v469_v19 }
 0x13c   : > { %v468_v21 = vpop.xlane.xlu1 %467 }
 0x13d   : > { %2212 = vrsqrt.f32 %v471_v20  ;;  %v470_v22 = vmul.f32 0.03125, %v468_v21 }
 0x13f   : > { %v472_v23 = vadd.f32 1e-05, %v470_v22 }
 0x141   : > { %2214 = vrsqrt.f32 %v472_v23 }
 0x14a   : > { %v2213_v24 = vpop.eup %2212 }
 0x14b   : > { %v475_v25 = vmul.f32 %v2213_v24, %v459_v7 }
 0x14d   : > { %v483_v29 = vmul.f32 %v1880_v26, %v475_v25 }
 0x14e   : > { %v2215_v27 = vpop.eup %2214 }
 0x14f   : > { %v476_v28 = vmul.f32 %v2215_v27, %v460_v11  ;;  %v491_v32 = vadd.f32 %v1881_v30, %v483_v29 }
 0x151   : > { %v484_v31 = vmul.f32 %v1880_v26, %v476_v28 }
 0x153   : > { %v492_v33 = vadd.f32 %v1881_v30, %v484_v31 }
 0x155   : > { %v493_v34 = vpack.c.bf16 %v492_v33, %v491_v32 }
 0x157   : > { %1992 = vmatmul.mubr.msk.bf16.vlgmr.msra.gmra.mxu0 %vm449_vm0, %v493_v34 }
 0x158   : > { %1997 = vmatprep.mubr.msk.bf16.mxu0 %vm2323_vm1, %v2322_v16 }
 0x217   : > { %v554_v36 = vpop.f32.mrf.mxu0 }
 0x218   : > { %v555_v37 = vadd.f32 %v1882_v35, %v554_v36 }
 0x219   : > { %v1993_v38 = vpop.f32.mrf.mxu0 }
 0x21a   : > { %v2500_v39 = vpack.c.bf16 %v555_v37, %v555_v37 }
 0x21b   : > { %v557_v40 = vpop.f32.mrf.mxu0 }
 0x21c   : > { %v558_v41 = vadd.f32 %v1882_v35, %v557_v40  ;;  %567 = vrot.lane.b32.xlu0 %v2500_v39, %s2324_s16 }
 0x21d   : > { %v1994_v42 = vpop.f32.mrf.mxu0 }
 0x21e   : > { %v2503_v43 = vpack.c.bf16 %v558_v41, %v558_v41 }
 0x220   : > { %616 = vrot.lane.b32.xlu1 %v2503_v43, %s2324_s16  ;;  %s2332_s16 = smov 72  }
 0x28e   : > { %v568_v44 = vpop.permute.xlu0 %567 }
 0x28f   : > { %v574_v45 = vsel %vm569_vm2, %v568_v44, 0 }
 0x290   : > { %1996 = vmatpush3.bf16.xpose.msra.mxu0 %v574_v45 }
 0x291   : > { %2001 = vmatprep.subr.bf16.mxu0 %v2322_v16 }
 0x292   : > { %v617_v46 = vpop.permute.xlu1 %616 }
 0x293   : > { %v622_v47 = vsel %vm569_vm2, %v617_v46, 0 }
 0x297   : > { %1998 = vmatmul.mubr.msk.bf16.vlgmr.msra.gmra.mxu0 %vm569_vm2, %v2500_v39 }
 0x298   : > { %2002 = vmatpush3.bf16.xpose.msra.mxu0 %v622_v47  ;;  %2003 = vmatprep.mubr.msk.bf16.mxu0 %vm2323_vm1, %v2322_v16 }
 0x299   : > { %2013 = vmatprep.subr.bf16.mxu0 %v2322_v16 }
 0x29f   : > { %2004 = vmatmul.mubr.msk.bf16.vlgmr.msra.gmra.mxu0 %vm569_vm2, %v2503_v43 }
 0x2a0   : > { %2015 = vmatprep.mubr.msk.bf16.mxu0 %vm2323_vm1, %v2322_v16 }
 0x357   : > { %v610_v48 = vpop.f32.mrf.mxu0 }
 0x358   : > { %v664_v49 = vsel %vm569_vm2, %v610_v48, -inf }
 0x359   : > { %665 = vmax.xlane.f32.xlu1 %v664_v49  ;;  %v1999_v50 = vpop.f32.mrf.mxu0 }
 0x35b   : > { %v613_v51 = vpop.f32.mrf.mxu0 }
 0x35d   : > { %v2000_v52 = vpop.f32.mrf.mxu0 }
 0x35f   : > { %v658_v53 = vpop.f32.mrf.mxu0 }
 0x360   : > { %v667_v54 = vsel %vm569_vm2, %v658_v53, -inf }
 0x361   : > { %668 = vmax.xlane.f32.xlu0 %v667_v54  ;;  %v2005_v55 = vpop.f32.mrf.mxu0 }
 0x363   : > { %v661_v56 = vpop.f32.mrf.mxu0 }
 0x365   : > { %v2006_v57 = vpop.f32.mrf.mxu0 }
 0x36a   : > { %737 = vrot.lane.b32.xlu1 %v2503_v43, %s2789_s20 }
 0x36e   : > { %787 = vrot.lane.b32.xlu1 %v2500_v39, %s2326_s21 }
 0x3e2   : > { %v666_v58 = vpop.xlane.xlu1 %665 }
 0x3e3   : > { %v670_v59 = vsub.f32 %v610_v48, %v666_v58 }
 0x3e5   : > { %v672_v60 = vmul.f32 1.442695, %v670_v59 }
 0x3e6   : > { %v738_v61 = vpop.permute.xlu1 %737 }
 0x3e7   : > { %2216 = vpow2.f32 %v672_v60  ;;  %v743_v62 = vsel %vm693_vm3, %v738_v61, 0 }
 0x3e8   : > { %2014 = vmatpush3.bf16.msra.mxu0 %v743_v62 }
 0x3e9   : > { %2025 = vmatprep.subr.bf16.mxu0 %v2322_v16 }
 0x3ea   : > { %v669_v63 = vpop.xlane.xlu0 %668  ;;  %v788_v9 = vpop.permute.xlu1 %787 }
 0x3eb   : > { %v671_v0 = vsub.f32 %v658_v53, %v669_v63  ;;  %v793_v17 = vsel %vm569_vm2, %v788_v9, 0 }
 0x3ed   : > { %v674_v3 = vmul.f32 1.442695, %v671_v0 }
 0x3ef   : > { %2218 = vpow2.f32 %v674_v3 }
 0x3f4   : > { %v2217_v4 = vpop.eup %2216 }
 0x3f5   : > { %v676_v5 = vsel %vm569_vm2, %v2217_v4, 0.0 }
 0x3f6   : > { %677 = vadd.xlane.f32.xlu0 %v676_v5 }
 0x3fc   : > { %v2219_v6 = vpop.eup %2218 }
 0x3fd   : > { %v679_v7 = vsel %vm569_vm2, %v2219_v6, 0.0 }
 0x3fe   : > { %680 = vadd.xlane.f32.xlu1 %v679_v7 }
 0x40c   : > { %688 = vrot.lane.b32.xlu0 %v2500_v39, %s2789_s20  ;;  %s432_s20 = sand.u32 1, %s2312_s26  }
 0x40d   : > { %s2733_s0 = scalar_lea.sflag [#allocation3], %s432_s20 }
 0x40f   : > { %837 = vrot.lane.b32.xlu1 %v2503_v43, %s2326_s21  ;;  %s2333_s21 = smov 104  }
 0x410   : > { %785 = vrot.lane.b32.xlu0 %v2500_v39, %s2327_s22 }
 0x413   : > { %835 = vrot.lane.b32.xlu1 %v2503_v43, %s2327_s22  ;;  %s2334_s22 = smov 40  }
 0x47f   : > { %v678_v8 = vpop.xlane.xlu0 %677 }
 0x480   : > { %2220 = vrcp.f32 %v678_v8 }
 0x483   : > { %v689_v10 = vpop.permute.xlu0 %688 }
 0x484   : > { %v695_v11 = vsel %vm693_vm3, %v689_v10, 0 }
 0x485   : > { %2008 = vmatpush3.bf16.msra.mxu1 %v695_v11 }
 0x486   : > { %2019 = vmatprep.subr.bf16.mxu1 %v2322_v16 }
 0x487   : > { %v681_v12 = vpop.xlane.xlu1 %680  ;;  %v786_v22 = vpop.permute.xlu0 %785 }
 0x488   : > { %2222 = vrcp.f32 %v681_v12 }
 0x48b   : > { %v838_v20 = vpop.permute.xlu1 %837 }
 0x48c   : > { %v843_v23 = vsel %vm569_vm2, %v838_v20, 0 }
 0x48d   : > { %v2221_v13 = vpop.eup %2220 }
 0x48e   : > { %v684_v14 = vmul.f32 %v2221_v13, %v2217_v4 }
 0x48f   : > { %v836_v24 = vpop.permute.xlu1 %835 }
 0x490   : > { %v686_v15 = vpack.c.bf16 %v684_v14, %v684_v14 }
 0x492   : > { %2010 = vmatmul.mubr.msk.bf16.vlgmr.msra.gmra.mxu1 %vm569_vm2, %v686_v15 }
 0x493   : > { %2020 = vmatpush3.bf16.xpose.msra.mxu1 %v793_v17  ;;  %2021 = vmatprep.mubr.msk.bf16.mxu1 %vm2323_vm1, %v2322_v16 }
 0x494   : > { %2031 = vmatprep.subr.bf16.mxu1 %v2322_v16 }
 0x495   : > { %v2223_v18 = vpop.eup %2222 }
 0x496   : > { %v685_v19 = vmul.f32 %v2223_v18, %v2219_v6 }
 0x498   : > { %v687_v21 = vpack.c.bf16 %v685_v19, %v685_v19 }
 0x49a   : > { %2016 = vmatmul.mubr.msk.bf16.vlgmr.msra.gmra.mxu0 %vm569_vm2, %v687_v21  ;;  %2022 = vmatmul.mubr.msk.bf16.vlgmr.msra.gmra.mxu1 %vm569_vm2, %v786_v22 }
 0x49b   : > { %2026 = vmatpush3.bf16.xpose.msra.mxu0 %v843_v23  ;;  %2027 = vmatprep.mubr.msk.bf16.mxu0 %vm2323_vm1, %v2322_v16 }
 0x49c   : > { %2037 = vmatprep.subr.bf16.mxu0 %v2322_v16  ;;  %2033 = vmatprep.mubr.msk.bf16.mxu1 %vm2323_vm1, %v2322_v16 }
 0x4a2   : > { %2028 = vmatmul.mubr.msk.bf16.vlgmr.msra.gmra.mxu0 %vm569_vm2, %v836_v24 }
 0x4a3   : > { %2039 = vmatprep.mubr.msk.bf16.mxu0 %vm2323_vm1, %v2322_v16 }
 0x552   : > { %v2550_v25 = vpop.f32.mrf.mxu1 }
 0x554   : > { %v2011_v26 = vpop.f32.mrf.mxu1 }
 0x556   : > { %v734_v27 = vpop.f32.mrf.mxu1 }
 0x558   : > { %v2012_v28 = vpop.f32.mrf.mxu1 }
 0x55a   : > { %v2552_v29 = vpop.f32.mrf.mxu0  ;;  %v829_v30 = vpop.f32.mrf.mxu1 }
 0x55b   : > { %v885_v31 = vsel %vm569_vm2, %v829_v30, -inf }
 0x55c   : > { %886 = vmax.xlane.f32.xlu0 %v885_v31  ;;  %v2017_v32 = vpop.f32.mrf.mxu0  ;;  %v2023_v33 = vpop.f32.mrf.mxu1 }
 0x55e   : > { %v782_v34 = vpop.f32.mrf.mxu0  ;;  %v832_v35 = vpop.f32.mrf.mxu1 }
 0x560   : > { %v2018_v36 = vpop.f32.mrf.mxu0  ;;  %v2024_v37 = vpop.f32.mrf.mxu1 }
 0x562   : > { %v879_v38 = vpop.f32.mrf.mxu0 }
 0x563   : > { %v888_v40 = vsel %vm569_vm2, %v879_v38, -inf }
 0x564   : > { %889 = vmax.xlane.f32.xlu1 %v888_v40  ;;  %v2029_v41 = vpop.f32.mrf.mxu0 }
 0x566   : > { %v882_v42 = vpop.f32.mrf.mxu0 }
 0x568   : > { %v2030_v44 = vpop.f32.mrf.mxu0 }
 0x575   : > { %957 = vrot.lane.b32.xlu1 %v2503_v43, %s2328_s23 }
 0x579   : > { %1007 = vrot.lane.b32.xlu1 %v2500_v39, %s2329_s24 }
 0x57d   : > { %1057 = vrot.lane.b32.xlu1 %v2503_v43, %s2329_s24  ;;  %s2336_s24 = smov 16  }
 0x581   : > { %1055 = vrot.lane.b32.xlu1 %v2503_v43, %s2330_s30 }
 0x5e5   : > { %v887_v45 = vpop.xlane.xlu0 %886 }
 0x5e6   : > { %v891_v46 = vsub.f32 %v829_v30, %v887_v45 }
 0x5e8   : > { %v893_v47 = vmul.f32 1.442695, %v891_v46 }
 0x5ea   : > { %2224 = vpow2.f32 %v893_v47 }
 0x5ed   : > { %v890_v48 = vpop.xlane.xlu1 %889 }
 0x5ee   : > { %v892_v49 = vsub.f32 %v879_v38, %v890_v48 }
 0x5f0   : > { %v895_v50 = vmul.f32 1.442695, %v892_v49 }
 0x5f1   : > { %v958_v51 = vpop.permute.xlu1 %957 }
 0x5f2   : > { %2226 = vpow2.f32 %v895_v50  ;;  %v963_v52 = vsel %vm693_vm3, %v958_v51, 0 }
 0x5f3   : > { %2038 = vmatpush3.bf16.msra.mxu0 %v963_v52 }
 0x5f4   : > { %2049 = vmatprep.subr.bf16.mxu0 %v2322_v16 }
 0x5f5   : > { %v1008_v63 = vpop.permute.xlu1 %1007 }
 0x5f6   : > { %v1013_v3 = vsel %vm569_vm2, %v1008_v63, 0 }
 0x5f7   : > { %v2225_v53 = vpop.eup %2224 }
 0x5f8   : > { %v897_v54 = vsel %vm569_vm2, %v2225_v53, 0.0 }
 0x5f9   : > { %898 = vadd.xlane.f32.xlu0 %v897_v54  ;;  %v1058_v6 = vpop.permute.xlu1 %1057 }
 0x5fa   : > { %v1063_v9 = vsel %vm569_vm2, %v1058_v6, 0 }
 0x5fd   : > { %v1056_v10 = vpop.permute.xlu1 %1055 }
 0x5ff   : > { %v2227_v55 = vpop.eup %2226 }
 0x600   : > { %v900_v56 = vsel %vm569_vm2, %v2227_v55, 0.0 }
 0x601   : > { %901 = vadd.xlane.f32.xlu0 %v900_v56 }
 0x617   : > { %909 = vrot.lane.b32.xlu0 %v2500_v39, %s2328_s23  ;;  %s2335_s23 = smov 8  }
 0x61b   : > { %1005 = vrot.lane.b32.xlu0 %v2500_v39, %s2330_s30  ;;  %s1932_s30 = sshll.u32 %s2431_s29, 7 }
 0x682   : > { %v899_v57 = vpop.xlane.xlu0 %898 }
 0x683   : > { %2228 = vrcp.f32 %v899_v57 }
 0x68a   : > { %v902_v58 = vpop.xlane.xlu0 %901 }
 0x68b   : > { %2230 = vrcp.f32 %v902_v58 }
 0x68e   : > { %v910_v59 = vpop.permute.xlu0 %909 }
 0x68f   : > { %v915_v60 = vsel %vm693_vm3, %v910_v59, 0 }
 0x690   : > { %v2229_v61 = vpop.eup %2228  ;;  %2032 = vmatpush3.bf16.msra.mxu1 %v915_v60 }
 0x691   : > { %2043 = vmatprep.subr.bf16.mxu1 %v2322_v16  ;;  %v905_v62 = vmul.f32 %v2229_v61, %v2225_v53 }
 0x692   : > { %v1006_v8 = vpop.permute.xlu0 %1005 }
 0x693   : > { %v907_v0 = vpack.c.bf16 %v905_v62, %v905_v62 }
 0x695   : > { %2034 = vmatmul.mubr.msk.bf16.vlgmr.msra.gmra.mxu1 %vm569_vm2, %v907_v0 }
 0x696   : > { %2044 = vmatpush3.bf16.xpose.msra.mxu1 %v1013_v3  ;;  %2045 = vmatprep.mubr.msk.bf16.mxu1 %vm2323_vm1, %v2322_v16 }
 0x697   : > { %2055 = vmatprep.subr.bf16.mxu1 %v2322_v16 }
 0x698   : > { %v2231_v4 = vpop.eup %2230 }
 0x699   : > { %v906_v5 = vmul.f32 %v2231_v4, %v2227_v55 }
 0x69b   : > { %v908_v7 = vpack.c.bf16 %v906_v5, %v906_v5 }
 0x69d   : > { %2040 = vmatmul.mubr.msk.bf16.vlgmr.msra.gmra.mxu0 %vm569_vm2, %v908_v7  ;;  %2046 = vmatmul.mubr.msk.bf16.vlgmr.msra.gmra.mxu1 %vm569_vm2, %v1006_v8 }
 0x69e   : > { %2050 = vmatpush3.bf16.xpose.msra.mxu0 %v1063_v9  ;;  %2051 = vmatprep.mubr.msk.bf16.mxu0 %vm2323_vm1, %v2322_v16 }
 0x69f   : > { %2061 = vmatprep.subr.bf16.mxu0 %v2322_v16  ;;  %2057 = vmatprep.mubr.msk.bf16.mxu1 %vm2323_vm1, %v2322_v16 }
 0x6a5   : > { %2052 = vmatmul.mubr.msk.bf16.vlgmr.msra.gmra.mxu0 %vm569_vm2, %v1056_v10 }
 0x6a6   : > { %2063 = vmatprep.mubr.msk.bf16.mxu0 %vm2323_vm1, %v2322_v16 }
 0x755   : > { %v2584_v11 = vpop.f32.mrf.mxu1 }
 0x757   : > { %v2035_v12 = vpop.f32.mrf.mxu1 }
 0x759   : > { %v954_v13 = vpop.f32.mrf.mxu1 }
 0x75b   : > { %v2036_v14 = vpop.f32.mrf.mxu1 }
 0x75d   : > { %v2586_v15 = vpop.f32.mrf.mxu0  ;;  %v1049_v17 = vpop.f32.mrf.mxu1 }
 0x75e   : > { %v2183_v18 = vpack.i.bf16 %v2586_v15, %v2584_v11  ;;  %v1105_v19 = vsel %vm569_vm2, %v1049_v17, -inf }
 0x75f   : > { %1106 = vmax.xlane.f32.xlu0 %v1105_v19  ;;  %v2041_v20 = vpop.f32.mrf.mxu0  ;;  %v2047_v21 = vpop.f32.mrf.mxu1 }
 0x761   : > { %v1002_v22 = vpop.f32.mrf.mxu0  ;;  %v1052_v23 = vpop.f32.mrf.mxu1 }
 0x763   : > { %v2042_v24 = vpop.f32.mrf.mxu0  ;;  %v2048_v26 = vpop.f32.mrf.mxu1 }
 0x765   : > { %v1099_v27 = vpop.f32.mrf.mxu0 }
 0x766   : > { %v1108_v28 = vsel %vm569_vm2, %v1099_v27, -inf }
 0x767   : > { %1109 = vmax.xlane.f32.xlu1 %v1108_v28  ;;  %v2053_v30 = vpop.f32.mrf.mxu0 }
 0x769   : > { %v1102_v31 = vpop.f32.mrf.mxu0 }
 0x76b   : > { %v2054_v32 = vpop.f32.mrf.mxu0 }
 0x778   : > { %1177 = vrot.lane.b32.xlu1 %v2503_v43, %s2331_s15 }
 0x77c   : > { %1227 = vrot.lane.b32.xlu1 %v2500_v39, %s2332_s16 }
 0x780   : > { %1277 = vrot.lane.b32.xlu1 %v2503_v43, %s2332_s16 }
 0x784   : > { %1275 = vrot.lane.b32.xlu1 %v2503_v43, %s2333_s21 }
 0x7e8   : > { %v1107_v33 = vpop.xlane.xlu0 %1106 }
 0x7e9   : > { %v1111_v34 = vsub.f32 %v1049_v17, %v1107_v33 }
 0x7eb   : > { %v1113_v35 = vmul.f32 1.442695, %v1111_v34 }
 0x7ed   : > { %2232 = vpow2.f32 %v1113_v35 }
 0x7f0   : > { %v1110_v36 = vpop.xlane.xlu1 %1109 }
 0x7f1   : > { %v1112_v37 = vsub.f32 %v1099_v27, %v1110_v36 }
 0x7f3   : > { %v1115_v38 = vmul.f32 1.442695, %v1112_v37 }
 0x7f4   : > { %v1178_v40 = vpop.permute.xlu1 %1177 }
 0x7f5   : > { %2234 = vpow2.f32 %v1115_v38  ;;  %v1183_v41 = vsel %vm693_vm3, %v1178_v40, 0 }
 0x7f6   : > { %2062 = vmatpush3.bf16.msra.mxu0 %v1183_v41 }
 0x7f7   : > { %2073 = vmatprep.subr.bf16.mxu0 %v2322_v16 }
 0x7f8   : > { %v1228_v53 = vpop.permute.xlu1 %1227 }
 0x7f9   : > { %v1233_v55 = vsel %vm569_vm2, %v1228_v53, 0 }
 0x7fa   : > { %v2233_v42 = vpop.eup %2232 }
 0x7fb   : > { %v1117_v44 = vsel %vm569_vm2, %v2233_v42, 0.0 }
 0x7fc   : > { %1118 = vadd.xlane.f32.xlu0 %v1117_v44  ;;  %v1278_v58 = vpop.permute.xlu1 %1277 }
 0x7fd   : > { %v1283_v61 = vsel %vm569_vm2, %v1278_v58, 0 }
 0x800   : > { %v1276_v62 = vpop.permute.xlu1 %1275 }
 0x802   : > { %v2235_v45 = vpop.eup %2234 }
 0x803   : > { %v1120_v46 = vsel %vm569_vm2, %v2235_v45, 0.0 }
 0x804   : > { %1121 = vadd.xlane.f32.xlu0 %v1120_v46  ;;  %v2201_v46 = vld [vmem:[%s2780_s5] sm:$0xff]  }
 0x81a   : > { %1129 = vrot.lane.b32.xlu0 %v2500_v39, %s2331_s15 }
 0x81e   : > { %1225 = vrot.lane.b32.xlu0 %v2500_v39, %s2333_s21 }
 0x885   : > { %v1119_v47 = vpop.xlane.xlu0 %1118 }
 0x886   : > { %2236 = vrcp.f32 %v1119_v47 }
 0x88d   : > { %v1122_v48 = vpop.xlane.xlu0 %1121 }
 0x88e   : > { %2238 = vrcp.f32 %v1122_v48 }
 0x891   : > { %v1130_v49 = vpop.permute.xlu0 %1129 }
 0x892   : > { %v1135_v50 = vsel %vm693_vm3, %v1130_v49, 0 }
 0x893   : > { %v2237_v51 = vpop.eup %2236  ;;  %2056 = vmatpush3.bf16.msra.mxu1 %v1135_v50 }
 0x894   : > { %2067 = vmatprep.subr.bf16.mxu1 %v2322_v16  ;;  %v1125_v52 = vmul.f32 %v2237_v51, %v2233_v42 }
 0x895   : > { %v1226_v60 = vpop.permute.xlu0 %1225 }
 0x896   : > { %v1127_v54 = vpack.c.bf16 %v1125_v52, %v1125_v52 }
 0x898   : > { %2058 = vmatmul.mubr.msk.bf16.vlgmr.msra.gmra.mxu1 %vm569_vm2, %v1127_v54 }
 0x899   : > { %2068 = vmatpush3.bf16.xpose.msra.mxu1 %v1233_v55  ;;  %2069 = vmatprep.mubr.msk.bf16.mxu1 %vm2323_vm1, %v2322_v16 }
 0x89a   : > { %2079 = vmatprep.subr.bf16.mxu1 %v2322_v16 }
 0x89b   : > { %v2239_v56 = vpop.eup %2238 }
 0x89c   : > { %v1126_v57 = vmul.f32 %v2239_v56, %v2235_v45  ;;  %v2200_v45 = vld [vmem:[%s2780_s5 + $0x8] sm:$0xff]  }
 0x89e   : > { %v1128_v59 = vpack.c.bf16 %v1126_v57, %v1126_v57 }
 0x8a0   : > { %2064 = vmatmul.mubr.msk.bf16.vlgmr.msra.gmra.mxu0 %vm569_vm2, %v1128_v59  ;;  %2070 = vmatmul.mubr.msk.bf16.vlgmr.msra.gmra.mxu1 %vm569_vm2, %v1226_v60 }
 0x8a1   : > { %2074 = vmatpush3.bf16.xpose.msra.mxu0 %v1283_v61  ;;  %2075 = vmatprep.mubr.msk.bf16.mxu0 %vm2323_vm1, %v2322_v16 }
 0x8a2   : > { %2085 = vmatprep.subr.bf16.mxu0 %v2322_v16  ;;  %2081 = vmatprep.mubr.msk.bf16.mxu1 %vm2323_vm1, %v2322_v16 }
 0x8a8   : > { %2076 = vmatmul.mubr.msk.bf16.vlgmr.msra.gmra.mxu0 %vm569_vm2, %v1276_v62 }
 0x8a9   : > { %2087 = vmatprep.mubr.msk.bf16.mxu0 %vm2323_vm1, %v2322_v16 }
 0x958   : > { %v1171_v63 = vpop.f32.mrf.mxu1 }
 0x95a   : > { %v2059_v0 = vpop.f32.mrf.mxu1 }
 0x95c   : > { %v1174_v3 = vpop.f32.mrf.mxu1 }
 0x95e   : > { %v2060_v4 = vpop.f32.mrf.mxu1 }
 0x960   : > { %v1219_v5 = vpop.f32.mrf.mxu0  ;;  %v1269_v6 = vpop.f32.mrf.mxu1 }
 0x961   : > { %v1325_v7 = vsel %vm569_vm2, %v1269_v6, -inf  ;;  %v2188_v23 = vpack.i.bf16 %v1219_v5, %v1171_v63 }
 0x962   : > { %1326 = vmax.xlane.f32.xlu0 %v1325_v7  ;;  %v2065_v8 = vpop.f32.mrf.mxu0  ;;  %v2071_v9 = vpop.f32.mrf.mxu1 }
 0x964   : > { %v1222_v10 = vpop.f32.mrf.mxu0  ;;  %v1272_v12 = vpop.f32.mrf.mxu1 }
 0x966   : > { %v2066_v13 = vpop.f32.mrf.mxu0  ;;  %v2072_v14 = vpop.f32.mrf.mxu1 }
 0x968   : > { %v1319_v17 = vpop.f32.mrf.mxu0 }
 0x969   : > { %v1328_v19 = vsel %vm569_vm2, %v1319_v17, -inf }
 0x96a   : > { %1329 = vmax.xlane.f32.xlu1 %v1328_v19  ;;  %v2077_v20 = vpop.f32.mrf.mxu0 }
 0x96c   : > { %v1322_v21 = vpop.f32.mrf.mxu0 }
 0x96e   : > { %v2078_v22 = vpop.f32.mrf.mxu0 }
 0x97b   : > { %1397 = vrot.lane.b32.xlu1 %v2503_v43, %s2334_s22 }
 0x97f   : > { %2184 = vrot.lane.b32.xlu1 %v2183_v18, %s2335_s23  ;;  %s2729_s23 = scalar_lea.hbm %s2788_s13, %s1932_s30 }
 0x983   : > { %2189 = vrot.lane.b32.xlu1 %v2188_v23, %s2336_s24  ;;  %s1877_s24 = sshll.u32 %s432_s20, 3 }
 0x984   : > { %s434_s15 = scalar_lea.vmem [#allocation2], %s1877_s24  ;;  %s2338_s24 = smov [#allocation2]  }
 0x985   : > { %s1811_s16 = sshll.u32 %s434_s15, 4  ;;  %s2264_s1 = sshll.u32 %s2338_s24, 4  ;;  %s2731_s16 = int_to_ptr.vmem [resolvable:$true] %s1811_s16  ;;  %s2265_s1 = int_to_ptr.vmem [resolvable:$false] %s2264_s1 }
 0x986   : > { %s2260_s29 = scalar_lea.vmem %s2731_s16, 128  ;;  %s2266_s21 = scalar_lea.vmem %s2265_s1, 256 }
 0x987   : > { %p2261_p11 = scmp.ne.s32.totalorder %s2731_s16, %s2260_s29  ;;  %p2267_p0 = scmp.lt.s32.totalorder %s2731_s16, %s2265_s1 }
 0x988   : > { %p2268_p1 = scmp.lt.s32.totalorder %s2266_s21, %s2260_s29 }
 0x989   : > { %p2262_p12 = pnand %p2261_p11, %p2448_p5 }
 0x98a   : > { %p2269_p2 = por %p2268_p1, %p2267_p0 }
 0x98b   : > { %p2263_p13 = pneg %p2262_p12 }
 0x98d   : > { %p2270_p3 = pnand %p2269_p2, %p2263_p13 }
 0x9eb   : > { %v1327_v24 = vpop.xlane.xlu0 %1326 }
 0x9ec   : > { %v1331_v26 = vsub.f32 %v1269_v6, %v1327_v24 }
 0x9ee   : > { %v1333_v27 = vmul.f32 1.442695, %v1331_v26 }
 0x9f0   : > { %2240 = vpow2.f32 %v1333_v27 }
 0x9f3   : > { %v1330_v28 = vpop.xlane.xlu1 %1329 }
 0x9f4   : > { %v1332_v30 = vsub.f32 %v1319_v17, %v1330_v28 }
 0x9f6   : > { %v1335_v31 = vmul.f32 1.442695, %v1332_v30 }
 0x9f7   : > { %v1398_v32 = vpop.permute.xlu1 %1397 }
 0x9f8   : > { %2242 = vpow2.f32 %v1335_v31  ;;  %v1403_v33 = vsel %vm693_vm3, %v1398_v32, 0 }
 0x9f9   : > { %2086 = vmatpush3.bf16.msra.mxu0 %v1403_v33  ;;  %v2202_v33 = vld [vmem:[%s2784_s9 + $0x8] sm:$0xff]  }
 0x9fa   : > { %2099 = vmatprep.subr.bf16.mxu0 %v2322_v16 }
 0x9fb   : > { %v2185_v56 = vpop.permute.xlu1 %2184 }
 0x9fc   : > { %v2187_v58 = vunpack.i.h.bf16 %v2185_v56  ;;  %v2186_v59 = vunpack.i.l.bf16 %v2185_v56  ;;  %v2211_v56 = vld [vmem:[%s2786_s11] sm:$0xff]  }
 0x9fd   : > { %v2241_v43 = vpop.eup %2240 }
 0x9fe   : > { %v1337_v11 = vsel %vm569_vm2, %v2241_v43, 0.0  ;;  %v1470_v63 = vsel %vm569_vm2, %v2552_v29, %v2187_v58  ;;  %v1469_v0 = vsel %vm569_vm2, %v2550_v25, %v2186_v59  ;;  %v1907_v29 = vld [vmem:[%s2781_s6] ss:$0 sm:$0xff] }
 0x9ff   : > { %1338 = vadd.xlane.f32.xlu0 %v1337_v11  ;;  %v2190_v57 = vpop.permute.xlu1 %2189 }
 0xa00   : > { %v2192_v60 = vunpack.i.h.bf16 %v2190_v57  ;;  %v2191_v61 = vunpack.i.l.bf16 %v2190_v57  ;;  %v1910_v57 = vld [vmem:[%s2785_s10] ss:$0 sm:$0xff] }
 0xa02   : > { %v1472_v5 = vsel %vm1471_vm4, %v1469_v0, %v2191_v61  ;;  %v1473_v6 = vsel %vm1471_vm4, %v1470_v63, %v2192_v60 }
 0xa05   : > { %v2243_v15 = vpop.eup %2242 }
 0xa06   : > { %v1340_v18 = vsel %vm569_vm2, %v2243_v15, 0.0 }
 0xa07   : > { %1341 = vadd.xlane.f32.xlu0 %v1340_v18 }
 0xa1d   : > { %1349 = vrot.lane.b32.xlu0 %v2500_v39, %s2334_s22  ;;  %s2337_s22 = smov 24  }
 0xa88   : > { %v1339_v34 = vpop.xlane.xlu0 %1338 }
 0xa89   : > { %2244 = vrcp.f32 %v1339_v34 }
 0xa90   : > { %v1342_v35 = vpop.xlane.xlu0 %1341 }
 0xa91   : > { %2246 = vrcp.f32 %v1342_v35 }
 0xa94   : > { %v1350_v36 = vpop.permute.xlu0 %1349 }
 0xa95   : > { %v1355_v37 = vsel %vm693_vm3, %v1350_v36, 0 }
 0xa96   : > { %v2245_v38 = vpop.eup %2244  ;;  %2080 = vmatpush3.bf16.msra.mxu1 %v1355_v37 }
 0xa97   : > { %v1345_v40 = vmul.f32 %v2245_v38, %v2241_v43  ;;  %2091 = vmatprep.subr.bf16.mxu1 %v2322_v16  ;;  %v2203_v43 = vld [vmem:[%s2784_s9] sm:$0xff]  }
 0xa99   : > { %v1347_v41 = vpack.c.bf16 %v1345_v40, %v1345_v40  ;;  %v1908_v40 = vld [vmem:[%s2782_s7] ss:$0 sm:$0xff] }
 0xa9b   : > { %2082 = vmatmul.mubr.msk.bf16.vlgmr.msra.gmra.mxu1 %vm569_vm2, %v1347_v41 }
 0xa9c   : > { %2095 = vmatprep.mubr.msk.bf16.mxu1 %vm2323_vm1, %v2322_v16  ;;  %2092 = vmatpush3.bf16.msra.mxu1 %v2200_v45 }
 0xa9d   : > { %2093 = vmatprep.subr.bf16.mxu1 %v2322_v16 }
 0xa9e   : > { %v2247_v42 = vpop.eup %2246 }
 0xa9f   : > { %v1346_v39 = vmul.f32 %v2247_v42, %v2243_v15 }
 0xaa0   : > { %2094 = vmatpush3.bf16.msra.mxu1 %v2201_v46 }
 0xaa1   : > { %v1348_v44 = vpack.c.bf16 %v1346_v39, %v1346_v39  ;;  %2107 = vmatprep.subr.bf16.mxu1 %v2322_v16 }
 0xaa3   : > { %2088 = vmatmul.mubr.msk.bf16.vlgmr.msra.gmra.mxu0 %vm569_vm2, %v1348_v44  ;;  %v1909_v44 = vld [vmem:[%s2783_s8] ss:$0 sm:$0xff] }
 0xaa4   : > { %2103 = vmatprep.mubr.msk.bf16.mxu0 %vm2323_vm1, %v2322_v16  ;;  %2100 = vmatpush3.bf16.msra.mxu0 %v2202_v33 }
 0xaa5   : > { %2101 = vmatprep.subr.bf16.mxu0 %v2322_v16 }
 0xaa8   : > { %2102 = vmatpush3.bf16.msra.mxu0 %v2203_v43 }
 0xb5b   : > { %v1391_v47 = vpop.f32.mrf.mxu1 }
 0xb5d   : > { %v2083_v48 = vpop.f32.mrf.mxu1 }
 0xb5f   : > { %v1394_v49 = vpop.f32.mrf.mxu1 }
 0xb60   : > { %v2204_v49 = vld [vmem:[%s2786_s11 + $0x38] sm:$0xff]  }
 0xb61   : > { %v2084_v50 = vpop.f32.mrf.mxu1 }
 0xb62   : > { %v2205_v50 = vld [vmem:[%s2786_s11 + $0x30] sm:$0xff]  }
 0xb63   : > { %v1439_v51 = vpop.f32.mrf.mxu0 }
 0xb64   : > { %v2193_v52 = vpack.i.bf16 %v1439_v51, %v1391_v47  ;;  %v2206_v51 = vld [vmem:[%s2786_s11 + $0x28] sm:$0xff]  }
 0xb65   : > { %v2089_v53 = vpop.f32.mrf.mxu0 }
 0xb66   : > { %2194 = vrot.lane.b32.xlu0 %v2193_v52, %s2337_s22  ;;  %v2207_v52 = vld [vmem:[%s2786_s11 + $0x20] sm:$0xff]   ;;  %v2208_v53 = vld [vmem:[%s2786_s11 + $0x18] sm:$0xff]  }
 0xb67   : > { %v1442_v54 = vpop.f32.mrf.mxu0 }
 0xb68   : > { %v2209_v54 = vld [vmem:[%s2786_s11 + $0x10] sm:$0xff]  }
 0xb69   : > { %v2090_v55 = vpop.f32.mrf.mxu0 }
 0xb6a   : > { %v2210_v55 = vld [vmem:[%s2786_s11 + $0x8] sm:$0xff]  }
 0xbd8   : > { %v2195_v62 = vpop.permute.xlu0 %2194 }
 0xbd9   : > { %v2197_v3 = vunpack.i.h.bf16 %v2195_v62  ;;  %v2196_v4 = vunpack.i.l.bf16 %v2195_v62 }
 0xbdb   : > { %v1476_v7 = vsel %vm1474_vm5, %v1473_v6, %v2197_v3  ;;  %v1475_v8 = vsel %vm1474_vm5, %v1472_v5, %v2196_v4 }
 0xbdc   : > { %v1477_v9 = vpack.c.bf16 %v1476_v7, %v1475_v8 }
 0xbde   : > { %2096 = vmatmul.mubr.msk.bf16.vlgmr.msra.gmra.mxu1 %vm449_vm0, %v1477_v9 }
 0xbdf   : > { %2123 = vmatprep.mubr.msk.bf16.mxu1 %vm2323_vm1, %v2322_v16  ;;  %2108 = vmatpush3.bf16.msra.mxu1 %v2204_v49 }
 0xbe0   : > { %2109 = vmatprep.subr.bf16.mxu1 %v2322_v16 }
 0xbe3   : > { %2110 = vmatpush3.bf16.msra.mxu1 %v2205_v50 }
 0xbe4   : > { %2111 = vmatprep.subr.bf16.mxu1 %v2322_v16 }
 0xbe7   : > { %2112 = vmatpush3.bf16.msra.mxu1 %v2206_v51 }
 0xbe8   : > { %2113 = vmatprep.subr.bf16.mxu1 %v2322_v16 }
 0xbeb   : > { %2114 = vmatpush3.bf16.msra.mxu1 %v2207_v52 }
 0xbec   : > { %2115 = vmatprep.subr.bf16.mxu1 %v2322_v16 }
 0xbef   : > { %2116 = vmatpush3.bf16.msra.mxu1 %v2208_v53 }
 0xbf0   : > { %2117 = vmatprep.subr.bf16.mxu1 %v2322_v16 }
 0xbf3   : > { %2118 = vmatpush3.bf16.msra.mxu1 %v2209_v54 }
 0xbf4   : > { %2119 = vmatprep.subr.bf16.mxu1 %v2322_v16 }
 0xbf7   : > { %2120 = vmatpush3.bf16.msra.mxu1 %v2210_v55 }
 0xbf8   : > { %2121 = vmatprep.subr.bf16.mxu1 %v2322_v16 }
 0xbfb   : > { %2122 = vmatpush3.bf16.msra.mxu1 %v2211_v56 }
 0xc9e   : > { %v1531_v10 = vpop.f32.mrf.mxu1 }
 0xc9f   : > { %v1538_v12 = vadd.f32 %v2462_v1, %v1531_v10 }
 0xca0   : > { %v2097_v25 = vpop.f32.mrf.mxu1 }
 0xca1   : > { %v2658_v13 = vadd.f32 %v1907_v29, %v1538_v12 }
 0xca2   : > { %v1534_v14 = vpop.f32.mrf.mxu1 }
 0xca3   : > { %v1539_v17 = vadd.f32 %v2464_v2, %v1534_v14  ;;  %v1551_v19 = vsel %vm449_vm0, %v2658_v13, 0.0  ;;  %v1916_v14 = vld [vmem:[%s2787_s12] ss:$0 sm:$0xff] }
 0xca4   : > { %1552 = vadd.xlane.f32.xlu1 %v1551_v19  ;;  %v2098_v20 = vpop.f32.mrf.mxu1 }
 0xca5   : > { %v2663_v21 = vadd.f32 %v1907_v29, %v1539_v17 }
 0xca7   : > { %v1554_v22 = vsel %vm449_vm0, %v2663_v21, 0.0 }
 0xca8   : > { %1555 = vadd.xlane.f32.xlu0 %v1554_v22 }
 0xd2d   : > { %v1553_v23 = vpop.xlane.xlu1 %1552 }
 0xd2e   : > { %v1557_v24 = vmul.f32 0.03125, %v1553_v23 }
 0xd30   : > { %v1559_v1 = vsub.f32 %v2658_v13, %v1557_v24 }
 0xd31   : > { %v1556_v26 = vpop.xlane.xlu0 %1555 }
 0xd32   : > { %v1558_v27 = vmul.f32 0.03125, %v1556_v26  ;;  %v1561_v28 = vmul.f32 %v1559_v1, %v1559_v1 }
 0xd34   : > { %v1560_v2 = vsub.f32 %v2663_v21, %v1558_v27  ;;  %v1563_v30 = vsel %vm449_vm0, %v1561_v28, 0.0 }
 0xd35   : > { %1564 = vadd.xlane.f32.xlu0 %v1563_v30 }
 0xd36   : > { %v1562_v31 = vmul.f32 %v1560_v2, %v1560_v2 }
 0xd38   : > { %v1566_v32 = vsel %vm449_vm0, %v1562_v31, 0.0 }
 0xd39   : > { %1567 = vadd.xlane.f32.xlu0 %v1566_v32 }
 0xdbe   : > { %v1565_v11 = vpop.xlane.xlu0 %1564 }
 0xdbf   : > { %v1569_v15 = vmul.f32 0.03125, %v1565_v11 }
 0xdc1   : > { %v1571_v18 = vadd.f32 1e-05, %v1569_v15 }
 0xdc2   : > { %v1568_v34 = vpop.xlane.xlu0 %1567 }
 0xdc3   : > { %2248 = vrsqrt.f32 %v1571_v18  ;;  %v1570_v35 = vmul.f32 0.03125, %v1568_v34 }
 0xdc5   : > { %v1572_v36 = vadd.f32 1e-05, %v1570_v35 }
 0xdc7   : > { %2250 = vrsqrt.f32 %v1572_v36 }
 0xdd0   : > { %v2249_v37 = vpop.eup %2248 }
 0xdd1   : > { %v1575_v38 = vmul.f32 %v2249_v37, %v1559_v1 }
 0xdd3   : > { %v1583_v39 = vmul.f32 %v1908_v40, %v1575_v38 }
 0xdd4   : > { %v2251_v41 = vpop.eup %2250 }
 0xdd5   : > { %v1576_v42 = vmul.f32 %v2251_v41, %v1560_v2  ;;  %v1591_v46 = vadd.f32 %v1909_v44, %v1583_v39 }
 0xdd7   : > { %v1584_v45 = vmul.f32 %v1908_v40, %v1576_v42 }
 0xdd9   : > { %v1592_v47 = vadd.f32 %v1909_v44, %v1584_v45 }
 0xddb   : > { %v1593_v48 = vpack.c.bf16 %v1592_v47, %v1591_v46 }
 0xddd   : > { %2104 = vmatmul.mubr.msk.bf16.vlgmr.msra.gmra.mxu0 %vm449_vm0, %v1593_v48 }
 0xe9d   : > { %v1654_v58 = vpop.f32.mrf.mxu0 }
 0xe9e   : > { %v1655_v59 = vadd.f32 %v1910_v57, %v1654_v58 }
 0xe9f   : > { %v2105_v60 = vpop.f32.mrf.mxu0 }
 0xea0   : > { %v1914_v61 = vmul.f32 -1.702, %v1655_v59 }
 0xea1   : > { %v1657_v62 = vpop.f32.mrf.mxu0 }
 0xea2   : > { %v1665_v63 = vmul.f32 1.442695, %v1914_v61  ;;  %v1658_v0 = vadd.f32 %v1910_v57, %v1657_v62 }
 0xea3   : > { %v2106_v3 = vpop.f32.mrf.mxu0 }
 0xea4   : > { %2252 = vpow2.f32 %v1665_v63  ;;  %v1915_v16 = vmul.f32 -1.702, %v1658_v0 }
 0xea6   : > { %v1667_v4 = vmul.f32 1.442695, %v1915_v16 }
 0xea8   : > { %2254 = vpow2.f32 %v1667_v4 }
 0xeb1   : > { %v2253_v5 = vpop.eup %2252 }
 0xeb2   : > { %v1669_v6 = vadd.f32 1.0, %v2253_v5 }
 0xeb4   : > { %2256 = vrcp.f32 %v1669_v6 }
 0xeb5   : > { %v2255_v7 = vpop.eup %2254 }
 0xeb6   : > { %v1670_v8 = vadd.f32 1.0, %v2255_v7 }
 0xeb8   : > { %2258 = vrcp.f32 %v1670_v8 }
 0xec1   : > { %v2257_v9 = vpop.eup %2256 }
 0xec2   : > { %v1675_v29 = vmul.f32 %v2257_v9, %v1655_v59 }
 0xec5   : > { %v2259_v10 = vpop.eup %2258 }
 0xec6   : > { %v1676_v12 = vmul.f32 %v2259_v10, %v1658_v0 }
 0xec8   : > { %v1677_v25 = vpack.c.bf16 %v1676_v12, %v1675_v29 }
 0xeca   : > { %2124 = vmatmul.mubr.bf16.vlgmr.msra.gmra.mxu1 %v1677_v25 }
 0xf8a   : > { %v1783_v17 = vpop.f32.mrf.mxu1 }
 0xf8b   : > { %v1784_v19 = vadd.f32 %v1916_v14, %v1783_v17 }
 0xf8c   : > { %v2125_v20 = vpop.f32.mrf.mxu1 }
 0xf8d   : > { %v1790_v22 = vadd.f32 %v1784_v19, %v2658_v13 }
 0xf8e   : > { %v1786_v23 = vpop.f32.mrf.mxu1 }
 0xf8f   : > { %v1792_v24 = vpack.c.bf16 %v1790_v22, %v1790_v22  ;;  %v1787_v1 = vadd.f32 %v1916_v14, %v1786_v23 }
 0xf90   : > { %v2126_v26 = vpop.f32.mrf.mxu1 }
 0xf91   : > { %1795 = vst.msk [vmem:[%s434_s15] sm:$0xf] %vm1794_vm6, %v1792_v24  ;;  %v1791_v27 = vadd.f32 %v1787_v1, %v2663_v21 }
 0xf93   : > { %v1793_v28 = vpack.c.bf16 %v1791_v27, %v1791_v27 }
 0xf95   : > { %1796 = vst.msk [vmem:[%s434_s15 + $0x4] sm:$0xf] %vm1794_vm6, %v1793_v28 }
 0xf96   : > { %2273 = shalt.err (!%p2270_p3)
}
 0xf97   : > { %s2274_s20 = scalar_lea.hbm %s2729_s23, 128  ;;  %s2278_s22 = scalar_lea.hbm %s2788_s13, 256 }
 0xf98   : > { %p2275_p4 = scmp.ne.s32.totalorder %s2729_s23, %s2274_s20  ;;  %p2279_p9 = scmp.lt.s32.totalorder %s2729_s23, %s2788_s13 }
 0xf99   : > { %p2280_p10 = scmp.lt.s32.totalorder %s2278_s22, %s2274_s20 }
 0xf9a   : > { %p2276_p7 = pnand %p2275_p4, %p2448_p5 }
 0xf9b   : > { %p2281_p11 = por %p2280_p10, %p2279_p9 }
 0xf9c   : > { %p2277_p8 = pneg %p2276_p7 }
 0xf9e   : > { %p2282_p12 = pnand %p2281_p11, %p2277_p8 }
 0xfa0   : > { %2285 = shalt.err (!%p2282_p12)
}
 0xfa1   : > { %s2339_s1 = smov 4   ;;  %s2798_s29 = smov 64  }
 0xfa2   : > { %2127 = dma.vmem_to_hbm [thread:$0]  (%p2448_p5), %s2731_s16, 128, %s2729_s23, %s2733_s0, %s2798_s29, %s2798_s29, %s2339_s1  }
 0xfa3 PF: > { %p2133_p13 = scmp.ge.s32.totalorder %s2320_s28, 2  ;;  %s1826_s2 = sand.u32 1, %s2308_s25  }
 0xfa4   : > { %s1827_s21 = scalar_lea.sflag [#allocation3], %s1826_s2 }
 0xfa5   : > { %p2130_p0 = pnand %p2133_p13, %p2452_p6 }
 0xfa7   : > { %p2131_p1 = pneg %p2130_p0 }
 0xfa9   : > { %2303 = dma.done.wait (%p2131_p1), %s1827_s21, 128  }
 0xfaa   : > { %2305 = vsyncadd (%p2131_p1), %s1827_s21, 4294967168  ;;  %p23_p2 = scmp.ge.s32.totalorder %s2435_s14, 4   ;;  %s2799_s25 = smov %s2312_s26 }
 0xfab   : > { %s2800_s26 = smov %s2316_s27  ;;  %s2801_s27 = smov %s2446_s17 }
 0xfac   : > { %s2802_s28 = smov %s2435_s14  ;;  %25 = sbr.rel (!%p23_p2) target bundleno = 7 (0x7), region = 107 }
 0xfb1   :  { %1832 = vsyncpa [#allocation3], 1 }
 0xfb2   :  { %1834 = vsyncpa [#allocation3 + $0x1], 1 }

</bundles_post_ra>
